<compile_context>
chip_gen: v5e
topology: v5e:2x2
jax: 0.10.0
libtpu: 0.0.40
codegen_flags: <defaults>
</compile_context>

<pallas_src>
import jax
import jax.numpy as jnp
from jax import lax
from jax.experimental import pallas as pl
from jax.experimental.pallas import tpu as pltpu

LEAKY_SLOPE = 0.01  # nn.LeakyReLU default


def _leaky_relu(x):
    return jnp.where(x >= 0, x, LEAKY_SLOPE * x)


def _message_kernel(idx_ref, logw_ref, fea_ref, in_fea_ref,
                    w1_ref, b1_ref, wg2_ref, bg2_ref, wm2_ref, bm2_ref, pw_ref,
                    out_ref, gates_ref):
    f32 = jnp.float32
    n_edges = fea_ref.shape[0]
    n_nodes, fea_len = in_fea_ref.shape
    n_heads = pw_ref.shape[1]

    fea = fea_ref[...]                                                    # (M, 2F)

    # ---- head-fused MLPs: all heads' gate_nn + message_nn hidden in one matmul --
    z1 = _leaky_relu(
        jnp.dot(fea, w1_ref[...], preferred_element_type=f32) + b1_ref[...])      # (M, H*(HG+HM))
    g_all = jnp.dot(z1, wg2_ref[...], preferred_element_type=f32) + bg2_ref[...]  # (M, H)
    msg_all = jnp.dot(z1, wm2_ref[...], preferred_element_type=f32) + bm2_ref[...]  # (M, H*F)

    # ---- one-hot segment membership, built ONCE and shared by every head -------
    idx = idx_ref[...]                                                    # (M, 1) int32
    node_ids = lax.broadcasted_iota(jnp.int32, (n_edges, n_nodes), 1)     # (M, N)
    mask = node_ids == idx                                                # (M, N) bool
    mask_f = mask.astype(f32)

    # w ** pow folded into the exp:  w**p * exp(g) == exp(p*log(w) + g)
    gate_log = pw_ref[...] * logw_ref[...] + g_all                        # (M, H)

    neg = f32(-1e30)
    acc = jnp.zeros((n_nodes, fea_len), f32)

    for h in range(n_heads):  # static unroll; n_heads is small
        g_h = g_all[:, h:h + 1]                                           # (M, 1)
        gl_h = gate_log[:, h:h + 1]                                       # (M, 1)

        # segment max (softmax stabilizer); gather back per edge on the MXU
        seg_max = jnp.max(jnp.where(mask, g_h, neg), axis=0, keepdims=True)   # (1, N)
        max_pe = lax.dot_general(mask_f, seg_max, (((1,), (1,)), ((), ())),
                                 preferred_element_type=f32)                  # (M, 1)
        gate_w = jnp.exp(gl_h - max_pe)                                       # (M, 1)

        # scatter-add numerator and denominator with MXU matmuls (mask^T @ ...)
        w_msg = gate_w * msg_all[:, h * fea_len:(h + 1) * fea_len]            # (M, F)
        num = lax.dot_general(mask_f, w_msg, (((0,), (0,)), ((), ())),
                              preferred_element_type=f32)                     # (N, F)
        seg_sum = lax.dot_general(mask_f, gate_w, (((0,), (0,)), ((), ())),
                                  preferred_element_type=f32)                 # (N, 1)

        # normalize AFTER the scatter: one (N, F) VPU multiply + reciprocal
        acc = acc + num * pl.reciprocal(seg_sum + 1e-10, approx=False)

        # per-edge normalized gates (denominator gathered back via MXU matmul)
        denom_e = jnp.dot(mask_f, seg_sum, preferred_element_type=f32)        # (M, 1)
        gates_ref[:, h:h + 1] = gate_w / (denom_e + 1e-10)

    out_ref[...] = acc * (1.0 / n_heads) + in_fea_ref[...]


def message_layer_forward(elem_weights, elem_in_fea, self_fea_idx, nbr_fea_idx, params):
    """elem_weights: (N,1) f32, elem_in_fea: (N,F) f32, idx arrays: (M,) int32."""
    (wg1, bg1, wg2, bg2, wm1, bm1, wm2, bm2, pw) = params
    n_nodes, fea_len = elem_in_fea.shape
    n_edges = self_fea_idx.shape[0]
    n_heads, _, hg = wg1.shape
    hm = wm1.shape[2]
    hh = n_heads * (hg + hm)

    # Gathers / concat are glue, done in plain JAX.
    elem_nbr_weights = elem_weights[nbr_fea_idx]                  # (M, 1)
    fea = jnp.concatenate(
        [elem_in_fea[self_fea_idx], elem_in_fea[nbr_fea_idx]], axis=1)  # (M, 2F)
    idx = self_fea_idx.astype(jnp.int32).reshape(n_edges, 1)
    log_w = jnp.log(elem_nbr_weights).astype(jnp.float32)         # (M, 1)

    # ---- stack / block-diagonalize per-head weights (once, outside the kernel) --
    w1 = jnp.concatenate(
        [wg1[h] for h in range(n_heads)] + [wm1[h] for h in range(n_heads)],
        axis=1).astype(jnp.float32)                               # (2F, HH)
    b1 = jnp.concatenate(
        [bg1[h] for h in range(n_heads)] + [bm1[h] for h in range(n_heads)],
        axis=1).astype(jnp.float32)                               # (1, HH)
    wg2f = jnp.zeros((hh, n_heads), jnp.float32)
    wm2f = jnp.zeros((hh, n_heads * fea_len), jnp.float32)
    for h in range(n_heads):
        wg2f = wg2f.at[h * hg:(h + 1) * hg, h:h + 1].set(wg2[h])
        wm2f = wm2f.at[n_heads * hg + h * hm:n_heads * hg + (h + 1) * hm,
                       h * fea_len:(h + 1) * fea_len].set(wm2[h])
    bg2r = jnp.concatenate([bg2[h] for h in range(n_heads)], axis=1).astype(jnp.float32)  # (1, H)
    bm2r = jnp.concatenate([bm2[h] for h in range(n_heads)], axis=1).astype(jnp.float32)  # (1, H*F)
    pw_r = pw.reshape(1, n_heads).astype(jnp.float32)             # (1, H)

    operands = (idx, log_w, fea.astype(jnp.float32), elem_in_fea.astype(jnp.float32),
                w1, b1, wg2f, bg2r, wm2f, bm2r, pw_r)

    def full_spec(a):
        return pl.BlockSpec(a.shape, lambda i: (0,) * a.ndim)

    out, gates = pl.pallas_call(
        _message_kernel,
        out_shape=(
            jax.ShapeDtypeStruct((n_nodes, fea_len), jnp.float32),
            jax.ShapeDtypeStruct((n_edges, n_heads), jnp.float32),   # lane-dense gates
        ),
        grid=(1,),
        in_specs=[full_spec(a) for a in operands],
        out_specs=(
            pl.BlockSpec((n_nodes, fea_len), lambda i: (0, 0)),
            pl.BlockSpec((n_edges, n_heads), lambda i: (0, 0)),
        ),
        compiler_params=pltpu.CompilerParams(dimension_semantics=("arbitrary",)),
    )(*operands)

    gate_list = [gates[:, h:h + 1] for h in range(n_heads)]
    return out, gate_list


# ---------------------------------------------------------------------------------
# Pure-JAX reference (same math, segment ops) for a correctness check.
# ---------------------------------------------------------------------------------
def message_layer_reference(elem_weights, elem_in_fea, self_idx, nbr_idx, params):
    (wg1, bg1, wg2, bg2, wm1, bm1, wm2, bm2, pw) = params
    n_nodes = elem_in_fea.shape[0]
    n_heads = wg1.shape[0]
    w = elem_weights[nbr_idx]
    fea = jnp.concatenate([elem_in_fea[self_idx], elem_in_fea[nbr_idx]], axis=1)
    heads, gates = [], []
    for h in range(n_heads):
        g = _leaky_relu(fea @ wg1[h] + bg1[h, 0]) @ wg2[h] + bg2[h, 0]
        g = g - jax.ops.segment_max(g, self_idx, num_segments=n_nodes)[self_idx]
        gate = jnp.power(w, pw[h, 0, 0]) * jnp.exp(g)
        denom = jax.ops.segment_sum(gate, self_idx, num_segments=n_nodes)[self_idx] + 1e-10
        gate = gate / denom
        msg = _leaky_relu(fea @ wm1[h] + bm1[h, 0]) @ wm2[h] + bm2[h, 0]
        heads.append(jax.ops.segment_sum(gate * msg, self_idx, num_segments=n_nodes))
        gates.append(gate)
    out = jnp.mean(jnp.stack(heads), axis=0) + elem_in_fea
    return out, gates


if __name__ == "__main__":
    # Small, module-consistent shapes.
    N = 16          # nodes (elements)
    M = 48          # edges (pairs)
    F = 32          # elem_fea_len
    H = 2           # elem_heads
    HG = 16         # elem_gate hidden dim  -> SimpleNetwork(2F, 1, [HG])
    HM = 16         # elem_msg  hidden dim  -> SimpleNetwork(2F, F, [HM])

    key = jax.random.PRNGKey(0)
    ks = jax.random.split(key, 16)

    def init(k, shape, scale=0.1):
        return (jax.random.normal(k, shape) * scale).astype(jnp.float32)

    # Deterministic synthetic parameters (per head, stacked on leading axis).
    wg1 = init(ks[0], (H, 2 * F, HG))
    bg1 = init(ks[1], (H, 1, HG))
    wg2 = init(ks[2], (H, HG, 1))
    bg2 = init(ks[3], (H, 1, 1))
    wm1 = init(ks[4], (H, 2 * F, HM))
    bm1 = init(ks[5], (H, 1, HM))
    wm2 = init(ks[6], (H, HM, F))
    bm2 = init(ks[7], (H, 1, F))
    pw = init(ks[8], (H, 1, 1), scale=1.0)      # WeightedAttentionPooling.pow ~ randn(1)
    params = (wg1, bg1, wg2, bg2, wm1, bm1, wm2, bm2, pw)

    # Inputs.
    elem_weights = jax.nn.softmax(jax.random.normal(ks[9], (N, 1)), axis=0).astype(jnp.float32)
    elem_in_fea = init(ks[10], (N, F), scale=1.0)
    self_fea_idx = jax.random.randint(ks[11], (M,), 0, N, dtype=jnp.int32)
    nbr_fea_idx = jax.random.randint(ks[12], (M,), 0, N, dtype=jnp.int32)

    out, gate_list = message_layer_forward(
        elem_weights, elem_in_fea, self_fea_idx, nbr_fea_idx, params)
    out = jax.block_until_ready(out)
    gate_list = [jax.block_until_ready(g) for g in gate_list]

    # Correctness check against a pure-JAX reference.
    out_ref, gates_ref = message_layer_reference(
        elem_weights, elem_in_fea, self_fea_idx, nbr_fea_idx, params)
    assert out.shape == (N, F) and len(gate_list) == H
    assert jnp.allclose(out, out_ref, rtol=1e-3, atol=1e-3)
    for g_k, g_r in zip(gate_list, gates_ref):
        assert g_k.shape == (M, 1)
        assert jnp.allclose(g_k, g_r, rtol=1e-3, atol=1e-3)

    print("KERNEL_OK")
</pallas_src>

<mosaic_0001>
module attributes {stable_mosaic.version = 11 : i64} {
  func.func @_message_kernel(%arg0: i32, %arg1: memref<48x1xi32, #tpu.memory_space<vmem>>, %arg2: memref<48x1xf32, #tpu.memory_space<vmem>>, %arg3: memref<48x64xf32, #tpu.memory_space<vmem>>, %arg4: memref<16x32xf32, #tpu.memory_space<vmem>>, %arg5: memref<64x64xf32, #tpu.memory_space<vmem>>, %arg6: memref<1x64xf32, #tpu.memory_space<vmem>>, %arg7: memref<64x2xf32, #tpu.memory_space<vmem>>, %arg8: memref<1x2xf32, #tpu.memory_space<vmem>>, %arg9: memref<64x64xf32, #tpu.memory_space<vmem>>, %arg10: memref<1x64xf32, #tpu.memory_space<vmem>>, %arg11: memref<1x2xf32, #tpu.memory_space<vmem>>, %arg12: memref<16x32xf32, #tpu.memory_space<vmem>>, %arg13: memref<48x2xf32, #tpu.memory_space<vmem>>) attributes {dimension_semantics = [#tpu.dimension_semantics<arbitrary>], iteration_bounds = array<i64: 1>, scalar_prefetch = 0 : i64, scratch_operands = 0 : i64, tpu.core_type = #tpu.core_type<tc>, window_params = [{pipeline_mode = #tpu.pipeline_mode<synchronous>, transform_indices = @transform_0, window_bounds = array<i64: 48, 1>}, {pipeline_mode = #tpu.pipeline_mode<synchronous>, transform_indices = @transform_1, window_bounds = array<i64: 48, 1>}, {pipeline_mode = #tpu.pipeline_mode<synchronous>, transform_indices = @transform_2, window_bounds = array<i64: 48, 64>}, {pipeline_mode = #tpu.pipeline_mode<synchronous>, transform_indices = @transform_3, window_bounds = array<i64: 16, 32>}, {pipeline_mode = #tpu.pipeline_mode<synchronous>, transform_indices = @transform_4, window_bounds = array<i64: 64, 64>}, {pipeline_mode = #tpu.pipeline_mode<synchronous>, transform_indices = @transform_5, window_bounds = array<i64: 1, 64>}, {pipeline_mode = #tpu.pipeline_mode<synchronous>, transform_indices = @transform_6, window_bounds = array<i64: 64, 2>}, {pipeline_mode = #tpu.pipeline_mode<synchronous>, transform_indices = @transform_7, window_bounds = array<i64: 1, 2>}, {pipeline_mode = #tpu.pipeline_mode<synchronous>, transform_indices = @transform_8, window_bounds = array<i64: 64, 64>}, {pipeline_mode = #tpu.pipeline_mode<synchronous>, transform_indices = @transform_9, window_bounds = array<i64: 1, 64>}, {pipeline_mode = #tpu.pipeline_mode<synchronous>, transform_indices = @transform_10, window_bounds = array<i64: 1, 2>}, {pipeline_mode = #tpu.pipeline_mode<synchronous>, transform_indices = @transform_11, window_bounds = array<i64: 16, 32>}, {pipeline_mode = #tpu.pipeline_mode<synchronous>, transform_indices = @transform_12, window_bounds = array<i64: 48, 2>}]} {
    %c0 = arith.constant 0 : index
    %c0_0 = arith.constant 0 : index
    %0 = vector.load %arg3[%c0, %c0_0] : memref<48x64xf32, #tpu.memory_space<vmem>>, vector<48x64xf32>
    %c0_1 = arith.constant 0 : index
    %c0_2 = arith.constant 0 : index
    %1 = vector.load %arg5[%c0_1, %c0_2] : memref<64x64xf32, #tpu.memory_space<vmem>>, vector<64x64xf32>
    %cst = arith.constant dense<0.000000e+00> : vector<48x64xf32>
    %2 = tpu.matmul %0, %1, %cst {dimension_numbers = #tpu.dot_dimension_numbers<[1], [0], [0], [1], [0, 0, 1, 1], [], []>} : vector<48x64xf32>, vector<64x64xf32>, vector<48x64xf32> -> vector<48x64xf32>
    %c0_3 = arith.constant 0 : index
    %c0_4 = arith.constant 0 : index
    %3 = vector.load %arg6[%c0_3, %c0_4] : memref<1x64xf32, #tpu.memory_space<vmem>>, vector<1x64xf32>
    %4 = vector.broadcast %3 : vector<1x64xf32> to vector<48x64xf32>
    %5 = arith.addf %2, %4 : vector<48x64xf32>
    %cst_5 = arith.constant 0.000000e+00 : f32
    %6 = vector.broadcast %cst_5 : f32 to vector<48x64xf32>
    %7 = arith.cmpf oge, %5, %6 : vector<48x64xf32>
    %cst_6 = arith.constant 0.00999999977 : f32
    %8 = vector.broadcast %cst_6 : f32 to vector<48x64xf32>
    %9 = arith.mulf %8, %5 : vector<48x64xf32>
    %10 = arith.select %7, %5, %9 : vector<48x64xi1>, vector<48x64xf32>
    %c0_7 = arith.constant 0 : index
    %c0_8 = arith.constant 0 : index
    %11 = vector.load %arg7[%c0_7, %c0_8] : memref<64x2xf32, #tpu.memory_space<vmem>>, vector<64x2xf32>
    %cst_9 = arith.constant dense<0.000000e+00> : vector<48x2xf32>
    %12 = tpu.matmul %10, %11, %cst_9 {dimension_numbers = #tpu.dot_dimension_numbers<[1], [0], [0], [1], [0, 0, 1, 1], [], []>} : vector<48x64xf32>, vector<64x2xf32>, vector<48x2xf32> -> vector<48x2xf32>
    %c0_10 = arith.constant 0 : index
    %c0_11 = arith.constant 0 : index
    %13 = vector.load %arg8[%c0_10, %c0_11] : memref<1x2xf32, #tpu.memory_space<vmem>>, vector<1x2xf32>
    %14 = vector.broadcast %13 : vector<1x2xf32> to vector<48x2xf32>
    %15 = arith.addf %12, %14 : vector<48x2xf32>
    %c0_12 = arith.constant 0 : index
    %c0_13 = arith.constant 0 : index
    %16 = vector.load %arg9[%c0_12, %c0_13] : memref<64x64xf32, #tpu.memory_space<vmem>>, vector<64x64xf32>
    %cst_14 = arith.constant dense<0.000000e+00> : vector<48x64xf32>
    %17 = tpu.matmul %10, %16, %cst_14 {dimension_numbers = #tpu.dot_dimension_numbers<[1], [0], [0], [1], [0, 0, 1, 1], [], []>} : vector<48x64xf32>, vector<64x64xf32>, vector<48x64xf32> -> vector<48x64xf32>
    %c0_15 = arith.constant 0 : index
    %c0_16 = arith.constant 0 : index
    %18 = vector.load %arg10[%c0_15, %c0_16] : memref<1x64xf32, #tpu.memory_space<vmem>>, vector<1x64xf32>
    %19 = vector.broadcast %18 : vector<1x64xf32> to vector<48x64xf32>
    %20 = arith.addf %17, %19 : vector<48x64xf32>
    %c0_17 = arith.constant 0 : index
    %c0_18 = arith.constant 0 : index
    %21 = vector.load %arg1[%c0_17, %c0_18] : memref<48x1xi32, #tpu.memory_space<vmem>>, vector<48x1xi32>
    %22 = tpu.iota {dimensions = array<i32: 1>} : vector<48x16xi32>
    %23 = vector.broadcast %21 : vector<48x1xi32> to vector<48x16xi32>
    %24 = arith.cmpi eq, %22, %23 : vector<48x16xi32>
    %25 = arith.extui %24 : vector<48x16xi1> to vector<48x16xi32>
    %26 = arith.sitofp %25 : vector<48x16xi32> to vector<48x16xf32>
    %c0_19 = arith.constant 0 : index
    %c0_20 = arith.constant 0 : index
    %27 = vector.load %arg11[%c0_19, %c0_20] : memref<1x2xf32, #tpu.memory_space<vmem>>, vector<1x2xf32>
    %c0_21 = arith.constant 0 : index
    %c0_22 = arith.constant 0 : index
    %28 = vector.load %arg2[%c0_21, %c0_22] : memref<48x1xf32, #tpu.memory_space<vmem>>, vector<48x1xf32>
    %29 = vector.broadcast %27 : vector<1x2xf32> to vector<48x2xf32>
    %30 = vector.broadcast %28 : vector<48x1xf32> to vector<48x2xf32>
    %31 = arith.mulf %29, %30 : vector<48x2xf32>
    %32 = arith.addf %31, %15 : vector<48x2xf32>
    %cst_23 = arith.constant 0.000000e+00 : f32
    %33 = vector.broadcast %cst_23 : f32 to vector<16x32xf32>
    %34 = vector.extract_strided_slice %15 {offsets = [0, 0], sizes = [48, 1], strides = [1, 1]} : vector<48x2xf32> to vector<48x1xf32>
    %35 = vector.extract_strided_slice %32 {offsets = [0, 0], sizes = [48, 1], strides = [1, 1]} : vector<48x2xf32> to vector<48x1xf32>
    %cst_24 = arith.constant -1.000000e+30 : f32
    %36 = vector.shape_cast %34 : vector<48x1xf32> to vector<48x1xf32>
    %37 = vector.broadcast %36 : vector<48x1xf32> to vector<48x16xf32>
    %38 = vector.broadcast %cst_24 : f32 to vector<48x16xf32>
    %39 = arith.select %24, %37, %38 : vector<48x16xi1>, vector<48x16xf32>
    %cst_25 = arith.constant dense<0xFF800000> : vector<16xf32>
    %40 = vector.multi_reduction <maximumf>, %39, %cst_25 [0] : vector<48x16xf32> to vector<16xf32>
    %41 = vector.shape_cast %40 : vector<16xf32> to vector<1x16xf32>
    %cst_26 = arith.constant dense<0.000000e+00> : vector<48x1xf32>
    %42 = tpu.matmul %26, %41, %cst_26 {dimension_numbers = #tpu.dot_dimension_numbers<[1], [1], [0], [0], [0, 0, 1, 0], [], []>} : vector<48x16xf32>, vector<1x16xf32>, vector<48x1xf32> -> vector<48x1xf32>
    %43 = arith.subf %35, %42 : vector<48x1xf32>
    %44 = math.exp %43 : vector<48x1xf32>
    %45 = vector.extract_strided_slice %20 {offsets = [0, 0], sizes = [48, 32], strides = [1, 1]} : vector<48x64xf32> to vector<48x32xf32>
    %46 = vector.broadcast %44 : vector<48x1xf32> to vector<48x32xf32>
    %47 = arith.mulf %46, %45 : vector<48x32xf32>
    %cst_27 = arith.constant dense<0.000000e+00> : vector<16x32xf32>
    %48 = tpu.matmul %26, %47, %cst_27 {dimension_numbers = #tpu.dot_dimension_numbers<[0], [0], [1], [1], [0, 1, 1, 1], [], []>} : vector<48x16xf32>, vector<48x32xf32>, vector<16x32xf32> -> vector<16x32xf32>
    %cst_28 = arith.constant dense<0.000000e+00> : vector<16x1xf32>
    %49 = tpu.matmul %26, %44, %cst_28 {dimension_numbers = #tpu.dot_dimension_numbers<[0], [0], [1], [1], [0, 1, 1, 1], [], []>} : vector<48x16xf32>, vector<48x1xf32>, vector<16x1xf32> -> vector<16x1xf32>
    %cst_29 = arith.constant 1.000000e-10 : f32
    %50 = vector.broadcast %cst_29 : f32 to vector<16x1xf32>
    %51 = arith.addf %49, %50 : vector<16x1xf32>
    %52 = tpu.reciprocal %51 : vector<16x1xf32> -> vector<16x1xf32>
    %53 = vector.broadcast %52 : vector<16x1xf32> to vector<16x32xf32>
    %54 = arith.mulf %48, %53 : vector<16x32xf32>
    %55 = arith.addf %33, %54 : vector<16x32xf32>
    %cst_30 = arith.constant dense<0.000000e+00> : vector<48x1xf32>
    %56 = tpu.matmul %26, %49, %cst_30 {dimension_numbers = #tpu.dot_dimension_numbers<[1], [0], [0], [1], [0, 0, 1, 1], [], []>} : vector<48x16xf32>, vector<16x1xf32>, vector<48x1xf32> -> vector<48x1xf32>
    %cst_31 = arith.constant 1.000000e-10 : f32
    %57 = vector.broadcast %cst_31 : f32 to vector<48x1xf32>
    %58 = arith.addf %56, %57 : vector<48x1xf32>
    %59 = arith.divf %44, %58 : vector<48x1xf32>
    %c0_32 = arith.constant 0 : index
    %c0_33 = arith.constant 0 : index
    %60 = vector.load %arg13[%c0_32, %c0_33] : memref<48x2xf32, #tpu.memory_space<vmem>>, vector<48x1xf32>
    tpu.vector_store %arg13[%c0_32, %c0_33], %59 {strides = array<i32>} : memref<48x2xf32, #tpu.memory_space<vmem>>, vector<48x1xf32>,
    %61 = vector.extract_strided_slice %15 {offsets = [0, 1], sizes = [48, 1], strides = [1, 1]} : vector<48x2xf32> to vector<48x1xf32>
    %62 = vector.extract_strided_slice %32 {offsets = [0, 1], sizes = [48, 1], strides = [1, 1]} : vector<48x2xf32> to vector<48x1xf32>
    %cst_34 = arith.constant -1.000000e+30 : f32
    %63 = vector.shape_cast %61 : vector<48x1xf32> to vector<48x1xf32>
    %64 = vector.broadcast %63 : vector<48x1xf32> to vector<48x16xf32>
    %65 = vector.broadcast %cst_34 : f32 to vector<48x16xf32>
    %66 = arith.select %24, %64, %65 : vector<48x16xi1>, vector<48x16xf32>
    %cst_35 = arith.constant dense<0xFF800000> : vector<16xf32>
    %67 = vector.multi_reduction <maximumf>, %66, %cst_35 [0] : vector<48x16xf32> to vector<16xf32>
    %68 = vector.shape_cast %67 : vector<16xf32> to vector<1x16xf32>
    %cst_36 = arith.constant dense<0.000000e+00> : vector<48x1xf32>
    %69 = tpu.matmul %26, %68, %cst_36 {dimension_numbers = #tpu.dot_dimension_numbers<[1], [1], [0], [0], [0, 0, 1, 0], [], []>} : vector<48x16xf32>, vector<1x16xf32>, vector<48x1xf32> -> vector<48x1xf32>
    %70 = arith.subf %62, %69 : vector<48x1xf32>
    %71 = math.exp %70 : vector<48x1xf32>
    %72 = vector.extract_strided_slice %20 {offsets = [0, 32], sizes = [48, 32], strides = [1, 1]} : vector<48x64xf32> to vector<48x32xf32>
    %73 = vector.broadcast %71 : vector<48x1xf32> to vector<48x32xf32>
    %74 = arith.mulf %73, %72 : vector<48x32xf32>
    %cst_37 = arith.constant dense<0.000000e+00> : vector<16x32xf32>
    %75 = tpu.matmul %26, %74, %cst_37 {dimension_numbers = #tpu.dot_dimension_numbers<[0], [0], [1], [1], [0, 1, 1, 1], [], []>} : vector<48x16xf32>, vector<48x32xf32>, vector<16x32xf32> -> vector<16x32xf32>
    %cst_38 = arith.constant dense<0.000000e+00> : vector<16x1xf32>
    %76 = tpu.matmul %26, %71, %cst_38 {dimension_numbers = #tpu.dot_dimension_numbers<[0], [0], [1], [1], [0, 1, 1, 1], [], []>} : vector<48x16xf32>, vector<48x1xf32>, vector<16x1xf32> -> vector<16x1xf32>
    %cst_39 = arith.constant 1.000000e-10 : f32
    %77 = vector.broadcast %cst_39 : f32 to vector<16x1xf32>
    %78 = arith.addf %76, %77 : vector<16x1xf32>
    %79 = tpu.reciprocal %78 : vector<16x1xf32> -> vector<16x1xf32>
    %80 = vector.broadcast %79 : vector<16x1xf32> to vector<16x32xf32>
    %81 = arith.mulf %75, %80 : vector<16x32xf32>
    %82 = arith.addf %55, %81 : vector<16x32xf32>
    %cst_40 = arith.constant dense<0.000000e+00> : vector<48x1xf32>
    %83 = tpu.matmul %26, %76, %cst_40 {dimension_numbers = #tpu.dot_dimension_numbers<[1], [0], [0], [1], [0, 0, 1, 1], [], []>} : vector<48x16xf32>, vector<16x1xf32>, vector<48x1xf32> -> vector<48x1xf32>
    %cst_41 = arith.constant 1.000000e-10 : f32
    %84 = vector.broadcast %cst_41 : f32 to vector<48x1xf32>
    %85 = arith.addf %83, %84 : vector<48x1xf32>
    %86 = arith.divf %71, %85 : vector<48x1xf32>
    %c0_42 = arith.constant 0 : index
    %c1 = arith.constant 1 : index
    %87 = vector.load %arg13[%c0_42, %c1] : memref<48x2xf32, #tpu.memory_space<vmem>>, vector<48x1xf32>
    tpu.vector_store %arg13[%c0_42, %c1], %86 {strides = array<i32>} : memref<48x2xf32, #tpu.memory_space<vmem>>, vector<48x1xf32>,
    %cst_43 = arith.constant 5.000000e-01 : f32
    %88 = vector.broadcast %cst_43 : f32 to vector<16x32xf32>
    %89 = arith.mulf %82, %88 : vector<16x32xf32>
    %c0_44 = arith.constant 0 : index
    %c0_45 = arith.constant 0 : index
    %90 = vector.load %arg4[%c0_44, %c0_45] : memref<16x32xf32, #tpu.memory_space<vmem>>, vector<16x32xf32>
    %91 = arith.addf %89, %90 : vector<16x32xf32>
    %c0_46 = arith.constant 0 : index
    %c0_47 = arith.constant 0 : index
    %92 = vector.load %arg12[%c0_46, %c0_47] : memref<16x32xf32, #tpu.memory_space<vmem>>, vector<16x32xf32>
    tpu.vector_store %arg12[%c0_46, %c0_47], %91 {strides = array<i32>} : memref<16x32xf32, #tpu.memory_space<vmem>>, vector<16x32xf32>,
    return
  }
  func.func @transform_0(%arg0: i32) -> (i32, i32) {
    %c0_i32 = arith.constant 0 : i32
    %c0_i32_0 = arith.constant 0 : i32
    %c0_i32_1 = arith.constant 0 : i32
    return %c0_i32, %c0_i32_0 : i32, i32
  }
  func.func @transform_1(%arg0: i32) -> (i32, i32) {
    %c0_i32 = arith.constant 0 : i32
    %c0_i32_0 = arith.constant 0 : i32
    %c0_i32_1 = arith.constant 0 : i32
    return %c0_i32, %c0_i32_0 : i32, i32
  }
  func.func @transform_2(%arg0: i32) -> (i32, i32) {
    %c0_i32 = arith.constant 0 : i32
    %c0_i32_0 = arith.constant 0 : i32
    %c0_i32_1 = arith.constant 0 : i32
    return %c0_i32, %c0_i32_0 : i32, i32
  }
  func.func @transform_3(%arg0: i32) -> (i32, i32) {
    %c0_i32 = arith.constant 0 : i32
    %c0_i32_0 = arith.constant 0 : i32
    %c0_i32_1 = arith.constant 0 : i32
    return %c0_i32, %c0_i32_0 : i32, i32
  }
  func.func @transform_4(%arg0: i32) -> (i32, i32) {
    %c0_i32 = arith.constant 0 : i32
    %c0_i32_0 = arith.constant 0 : i32
    %c0_i32_1 = arith.constant 0 : i32
    return %c0_i32, %c0_i32_0 : i32, i32
  }
  func.func @transform_5(%arg0: i32) -> (i32, i32) {
    %c0_i32 = arith.constant 0 : i32
    %c0_i32_0 = arith.constant 0 : i32
    %c0_i32_1 = arith.constant 0 : i32
    return %c0_i32, %c0_i32_0 : i32, i32
  }
  func.func @transform_6(%arg0: i32) -> (i32, i32) {
    %c0_i32 = arith.constant 0 : i32
    %c0_i32_0 = arith.constant 0 : i32
    %c0_i32_1 = arith.constant 0 : i32
    return %c0_i32, %c0_i32_0 : i32, i32
  }
  func.func @transform_7(%arg0: i32) -> (i32, i32) {
    %c0_i32 = arith.constant 0 : i32
    %c0_i32_0 = arith.constant 0 : i32
    %c0_i32_1 = arith.constant 0 : i32
    return %c0_i32, %c0_i32_0 : i32, i32
  }
  func.func @transform_8(%arg0: i32) -> (i32, i32) {
    %c0_i32 = arith.constant 0 : i32
    %c0_i32_0 = arith.constant 0 : i32
    %c0_i32_1 = arith.constant 0 : i32
    return %c0_i32, %c0_i32_0 : i32, i32
  }
  func.func @transform_9(%arg0: i32) -> (i32, i32) {
    %c0_i32 = arith.constant 0 : i32
    %c0_i32_0 = arith.constant 0 : i32
    %c0_i32_1 = arith.constant 0 : i32
    return %c0_i32, %c0_i32_0 : i32, i32
  }
  func.func @transform_10(%arg0: i32) -> (i32, i32) {
    %c0_i32 = arith.constant 0 : i32
    %c0_i32_0 = arith.constant 0 : i32
    %c0_i32_1 = arith.constant 0 : i32
    return %c0_i32, %c0_i32_0 : i32, i32
  }
  func.func @transform_11(%arg0: i32) -> (i32, i32) {
    %c0_i32 = arith.constant 0 : i32
    %c0_i32_0 = arith.constant 0 : i32
    %c0_i32_1 = arith.constant 0 : i32
    return %c0_i32, %c0_i32_0 : i32, i32
  }
  func.func @transform_12(%arg0: i32) -> (i32, i32) {
    %c0_i32 = arith.constant 0 : i32
    %c0_i32_0 = arith.constant 0 : i32
    %c0_i32_1 = arith.constant 0 : i32
    return %c0_i32, %c0_i32_0 : i32, i32
  }
}

</mosaic_0001>

<bundles_post_ra>
// kernel: tpu_custom_call.1
= control target key start
LH: loop header
LB: loop body
LE: loop exit
PB: predicated region body
PF: predicated region fallthrough
CT: control target
= control target key end

     0   :  { %18 = vsyncpa [#allocation3], 0  ;;  %s2156_s0 = inlined_call_operand.vmem [shape: s32[48,1], index: 0, kind: input, shape index: {}]   ;;  %s2157_s1 = inlined_call_operand.vmem [shape: f32[48,1], index: 1, kind: input, shape index: {}]   ;;  %s2158_s2 = inlined_call_operand.hbm [shape: f32[48,64], index: 2, kind: input, shape index: {}]   ;;  %s2159_s3 = inlined_call_operand.vmem [shape: f32[16,32], index: 3, kind: input, shape index: {}]   ;;  %s2160_s4 = inlined_call_operand.vmem [shape: f32[64,64], index: 4, kind: input, shape index: {}]   ;;  %s2161_s5 = inlined_call_operand.vmem [shape: f32[1,64], index: 5, kind: input, shape index: {}]   ;;  %s2162_s6 = inlined_call_operand.vmem [shape: f32[64,2], index: 6, kind: input, shape index: {}]   ;;  %s2163_s7 = inlined_call_operand.vmem [shape: f32[1,2], index: 7, kind: input, shape index: {}]   ;;  %s2164_s8 = inlined_call_operand.vmem [shape: f32[64,64], index: 8, kind: input, shape index: {}]   ;;  %s2165_s9 = inlined_call_operand.vmem [shape: f32[1,64], index: 9, kind: input, shape index: {}]   ;;  %s2166_s10 = inlined_call_operand.vmem [shape: f32[1,2], index: 10, kind: input, shape index: {}]   ;;  %s2167_s11 = inlined_call_operand.hbm [shape: f32[16,32], index: 11, kind: output, shape index: {0}]   ;;  %s2168_s12 = inlined_call_operand.vmem [shape: f32[48,2], index: 12, kind: output, shape index: {1}]  }
   0x1   :  { %19 = vsyncpa [#allocation4], 0  ;;  %s28_s23 = sshll.u32 %s2158_s2, 4  ;;  %s1436_s24 = smov [#allocation2]   ;;  %s29_s23 = int_to_ptr.hbm [resolvable:$true] %s28_s23 }
   0x2   :  { %s30_s25 = sshll.u32 %s1436_s24, 4  ;;  %s1437_s26 = smov 128   ;;  %s31_s25 = int_to_ptr.vmem [resolvable:$true] %s30_s25 }
   0x3   :  { %s1438_s27 = smov 8  }
   0x4   :  { %36 = dma.hbm_to_vmem [thread:$0]  %s29_s23, 768, %s31_s25, [#allocation3], %s1437_s26, %s1437_s26, %s1438_s27  }
   0x5   :  { %1432 = dma.done.wait [#allocation3], 768  }
   0x6   :  { %1433 = vsyncadd [#allocation3], 4294966528  ;;  %v70_v0 = vld [vmem:[%s2160_s4 + $0x38] sm:$0xff]  ;;  %v69_v1 = vld [vmem:[%s2160_s4 + $0x30] sm:$0xff]  ;;  %vm75_vm0 = vcmask 523264   ;;  %v1439_v11 = vmov 0  }
   0x7   :  { %102 = vmatpush.msra.mxu0 %v70_v0  ;;  %v68_v2 = vld [vmem:[%s2160_s4 + $0x28] sm:$0xff]  ;;  %v67_v3 = vld [vmem:[%s2160_s4 + $0x20] sm:$0xff]  ;;  %v66_v4 = vld [vmem:[%s2160_s4 + $0x18] sm:$0xff]  ;;  %1280 = vset.pattern.permute.xlu1 %v1439_v11  ;;  %vm391_vm11 = vcmask 130048   ;;  %vm519_vm14 = vcmask 392192   ;;  %s1445_s14 = smov [#allocation5]  }
   0x8   :  { %v65_v5 = vld [vmem:[%s2160_s4 + $0x10] sm:$0xff]  ;;  %v64_v6 = vld [vmem:[%s2160_s4 + $0x8] sm:$0xff]  ;;  %v63_v7 = vld [vmem:[%s2160_s4] sm:$0xff]  ;;  %1281 = vset.pattern.permute.xlu2 %v1439_v11  ;;  %1279 = vset.pattern.permute.xlu0 %v1439_v11  ;;  %s1443_s4 = smov 96   ;;  %s1192_s15 = sshll.u32 %s1445_s14, 4  ;;  %s1193_s15 = int_to_ptr.vmem [resolvable:$true] %s1192_s15 }
   0x9   :  { %103 = vmatpush.msra.mxu0 %v69_v1  ;;  %v57_v8 = vld [vmem:[#allocation2] sm:$0xff]  ;;  %v58_v9 = vld [vmem:[#allocation2 + $0x8] sm:$0xff]  ;;  %v154_v12 = vld [vmem:[%s2162_s6 + $0x38] sm:$0xff]  ;;  %s1194_s18 = sshll.u32 %s2167_s11, 4  ;;  %s1195_s18 = int_to_ptr.hbm [resolvable:$true] %s1194_s18 }
   0xa   :  { %v263_v10 = vld [vmem:[%s2156_s0 + $0x20] sm:$0xff]  ;;  %v219_v13 = vld [vmem:[%s2164_s8 + $0x38] sm:$0xff]  ;;  %185 = vmatpush.msra.mxu1 %v154_v12  ;;  %v153_v14 = vld [vmem:[%s2162_s6 + $0x30] sm:$0xff] }
   0xb   :  { %104 = vmatpush.msra.mxu0 %v68_v2  ;;  %280 = vperm.xlu1 %1280, %v263_v10   ;;  %v218_v15 = vld [vmem:[%s2164_s8 + $0x30] sm:$0xff]  ;;  %v152_v16 = vld [vmem:[%s2162_s6 + $0x28] sm:$0xff]  ;;  %v151_v19 = vld [vmem:[%s2162_s6 + $0x20] sm:$0xff] }
   0xc   :  { %1255 = vmatpush.msra.mxu2 %v219_v13  ;;  %186 = vmatpush.msra.mxu1 %v153_v14  ;;  %v217_v17 = vld [vmem:[%s2164_s8 + $0x28] sm:$0xff]  ;;  %v59_v18 = vld [vmem:[#allocation2 + $0x10] sm:$0xff]  ;;  %v216_v20 = vld [vmem:[%s2164_s8 + $0x20] sm:$0xff] }
   0xd   :  { %105 = vmatpush.msra.mxu0 %v67_v3  ;;  %v264_v21 = vld [vmem:[%s2156_s0 + $0x28] sm:$0xff]  ;;  %v150_v22 = vld [vmem:[%s2162_s6 + $0x18] sm:$0xff]  ;;  %v61_v26 = vld [vmem:[#allocation2 + $0x20] sm:$0xff] }
   0xe   :  { %1256 = vmatpush.msra.mxu2 %v218_v15  ;;  %187 = vmatpush.msra.mxu1 %v152_v16  ;;  %v215_v23 = vld [vmem:[%s2164_s8 + $0x18] sm:$0xff]  ;;  %v309_v27 = vld [vmem:[%s2157_s1 + $0x28] sm:$0xff]  ;;  %v306_v30 = vld [vmem:[%s2157_s1 + $0x10] sm:$0xff] }
   0xf   :  { %106 = vmatpush.msra.mxu0 %v66_v4  ;;  %v60_v24 = vld [vmem:[#allocation2 + $0x18] sm:$0xff]  ;;  %v62_v28 = vld [vmem:[#allocation2 + $0x28] sm:$0xff]  ;;  %v149_v31 = vld [vmem:[%s2162_s6 + $0x10] sm:$0xff] }
  0x10   :  { %1257 = vmatpush.msra.mxu2 %v217_v17  ;;  %188 = vmatpush.msra.mxu1 %v151_v19  ;;  %v262_v25 = vld [vmem:[%s2156_s0 + $0x18] sm:$0xff]  ;;  %v214_v32 = vld [vmem:[%s2164_s8 + $0x10] sm:$0xff]  ;;  %v148_v33 = vld [vmem:[%s2162_s6 + $0x8] sm:$0xff] }
  0x11   :  { %107 = vmatpush.msra.mxu0 %v65_v5  ;;  %v307_v29 = vld [vmem:[%s2157_s1 + $0x18] sm:$0xff]  ;;  %v213_v34 = vld [vmem:[%s2164_s8 + $0x8] sm:$0xff]  ;;  %v147_v35 = vld [vmem:[%s2162_s6] sm:$0xff] }
  0x12   :  { %1258 = vmatpush.msra.mxu2 %v216_v20  ;;  %189 = vmatpush.msra.mxu1 %v150_v22  ;;  %v212_v36 = vld [vmem:[%s2164_s8] sm:$0xff]  ;;  %v305_v37 = vld [vmem:[%s2157_s1 + $0x8] sm:$0xff]  ;;  %v261_v48 = vld [vmem:[%s2156_s0 + $0x10] sm:$0xff] }
  0x13   :  { %108 = vmatpush.msra.mxu0 %v64_v6  ;;  %283 = vperm.xlu1 %1280, %v264_v21   ;;  %v304_v38 = vld [vmem:[%s2157_s1] sm:$0xff]  ;;  %v260_v3 = vld [vmem:[%s2156_s0 + $0x8] sm:$0xff] }
  0x14   :  { %1259 = vmatpush.msra.mxu2 %v215_v23  ;;  %190 = vmatpush.msra.mxu1 %v149_v31  ;;  %v1324_v39 = vld [vmem:[%s2161_s5] ss:$0 sm:$0xff] }
  0x15   :  { %109 = vmatpush.msra.mxu0 %v63_v7  ;;  %274 = vperm.xlu2 %1281, %v261_v48   ;;  %v259_v49 = vld [vmem:[%s2156_s0] sm:$0xff]  ;;  %v1440_v7 = vmov 1  }
  0x16   :  { %1211 = vmatmul.msk.f32.vlgmr.msra.gmra.mxu0 %vm75_vm0, %v57_v8  ;;  %1260 = vmatpush.msra.mxu2 %v214_v32  ;;  %v308_v53 = vld [vmem:[%s2157_s1 + $0x20] sm:$0xff] }
  0x17   :  { %232 = vmatpush.msrb.mxu0 %v219_v13  ;;  %191 = vmatpush.msra.mxu1 %v148_v33  ;;  %v1326_v12 = vld [vmem:[%s2163_s7] ss:$0 sm:$0xff]  ;;  %s1442_s7 = smov 127  }
  0x18   :  { %1261 = vmatpush.msra.mxu2 %v213_v34  ;;  %268 = vperm.xlu0 %1279, %v259_v49  }
  0x19   :  { %233 = vmatpush.msrb.mxu0 %v218_v15  ;;  %192 = vmatpush.msra.mxu1 %v147_v35  ;;  %v1664_v15 = vld [vmem:[%s2166_s10] ss:$0 sm:$0xff] }
  0x1a   :  { %1262 = vmatpush.msra.mxu2 %v212_v36 }
  0x1b   :  { %234 = vmatpush.msrb.mxu0 %v217_v17  ;;  %277 = vperm.xlu1 %1280, %v262_v25  }
  0x1d   :  { %235 = vmatpush.msrb.mxu0 %v216_v20  ;;  %335 = vperm.xlu2 %1281, %v308_v53  }
  0x1e   :  { %1212 = vmatmul.msk.f32.gmra.mxu0 %vm75_vm0, %v58_v9 }
  0x1f   :  { %236 = vmatpush.msrb.mxu0 %v215_v23 }
  0x20   :  { %271 = vperm.xlu0 %1279, %v260_v3  }
  0x21   :  { %237 = vmatpush.msrb.mxu0 %v214_v32 }
  0x23   :  { %340 = vperm.xlu1 %1280, %v309_v27   ;;  %238 = vmatpush.msrb.mxu0 %v213_v34 }
  0x25   :  { %239 = vmatpush.msrb.mxu0 %v212_v36  ;;  %1282 = vset.pattern.permute.xlu2 %v1440_v7 }
  0x26   :  { %1213 = vmatmul.msk.f32.gmra.mxu0 %vm75_vm0, %v59_v18 }
  0x28   :  { %1285 = vset.pattern.permute.xlu0 %v1440_v7 }
  0x2b   :  { %330 = vperm.xlu1 %1280, %v307_v29  }
  0x2e   :  { %1214 = vmatmul.msk.f32.gmra.mxu0 %vm75_vm0, %v60_v24 }
  0x33   :  { %325 = vperm.xlu1 %1280, %v306_v30  }
  0x36   :  { %1215 = vmatmul.msk.f32.gmra.mxu0 %vm75_vm0, %v61_v26 }
  0x3b   :  { %320 = vperm.xlu1 %1280, %v305_v37  }
  0x3e   :  { %1216 = vmatmul.msk.f32.gmra.mxu0 %vm75_vm0, %v62_v28 }
  0x43   :  { %315 = vperm.xlu1 %1280, %v304_v38  }
  0x6f   :  { %v1686_v35 = vpop.permute.xlu2 %274 }
  0x77   :  { %v1688_v36 = vpop.permute.xlu2 %335 }
  0x7d   :  { %v1649_v4 = vpop.permute.xlu1 %280 }
  0x85   :  { %v1651_v5 = vpop.permute.xlu1 %283 }
  0x8d   :  { %v1653_v6 = vpop.permute.xlu1 %277 }
  0x93   :  { %v111_v40 = vpop.f32.mrf.mxu0 }
  0x94   :  { %v112_v41 = vadd.f32 %v1324_v39, %v111_v40 }
  0x95   :  { %v341_v8 = vpop.permute.xlu1 %340 }
  0x96   :  { %v135_v42 = vmul.f32 0.01, %v112_v41  ;;  %vm129_vm1 = vcmp.ge.f32.partialorder %v112_v41, 0.0  ;;  %v348_v31 = vmul.f32 %v1664_v15, %v341_v8 }
  0x98   :  { %v141_v43 = vsel %vm129_vm1, %v112_v41, %v135_v42 }
  0x99   :  { %1217 = vmatmul.msk.f32.vlgmr.msra.gmra.mxu1 %vm75_vm0, %v141_v43  ;;  %1223 = vmatmul.msk.f32.vlgmr.msrb.gmra.mxu0 %vm75_vm0, %v141_v43 }
  0x9b   :  { %v114_v44 = vpop.f32.mrf.mxu0 }
  0x9c   :  { %v115_v45 = vadd.f32 %v1324_v39, %v114_v44 }
  0x9d   :  { %v331_v9 = vpop.permute.xlu1 %330 }
  0x9e   :  { %v136_v46 = vmul.f32 0.01, %v115_v45  ;;  %vm130_vm2 = vcmp.ge.f32.partialorder %v115_v45, 0.0  ;;  %v346_v25 = vmul.f32 %v1664_v15, %v331_v9 }
  0xa0   :  { %v142_v47 = vsel %vm130_vm2, %v115_v45, %v136_v46  ;;  %v265_v46 = vlaneseq }
  0xa1   :  { %1218 = vmatmul.msk.f32.gmra.mxu1 %vm75_vm0, %v142_v47  ;;  %1224 = vmatmul.msk.f32.gmra.mxu0 %vm75_vm0, %v142_v47 }
  0xa2   :  { %v1696_v47 = vand.u32 127, %v265_v46 }
  0xa3   :  { %v117_v50 = vpop.f32.mrf.mxu0 }
  0xa4   :  { %v118_v51 = vadd.f32 %v1324_v39, %v117_v50  ;;  %vm289_vm7 = vcmp.eq.s32.totalorder %v1696_v47, %v1649_v4  ;;  %vm288_vm10 = vcmp.eq.s32.totalorder %v1696_v47, %v1653_v6  ;;  %vm290_vm12 = vcmp.eq.s32.totalorder %v1696_v47, %v1651_v5 }
  0xa5   :  { %v326_v10 = vpop.permute.xlu1 %325  ;;  %vm287_vm13 = vcmp.eq.s32.totalorder %v1696_v47, %v1686_v35 }
  0xa6   :  { %v137_v52 = vmul.f32 0.01, %v118_v51  ;;  %vm131_vm3 = vcmp.ge.f32.partialorder %v118_v51, 0.0  ;;  %v345_v21 = vmul.f32 %v1664_v15, %v326_v10 }
  0xa8   :  { %v143_v54 = vsel %vm131_vm3, %v118_v51, %v137_v52  ;;  %vm759_vm3 = vcmask 7168  }
  0xa9   :  { %1219 = vmatmul.msk.f32.gmra.mxu1 %vm75_vm0, %v143_v54  ;;  %1225 = vmatmul.msk.f32.vlgmr.msra.gmra.mxu2 %vm75_vm0, %v143_v54 }
  0xab   :  { %v120_v55 = vpop.f32.mrf.mxu0 }
  0xac   :  { %v121_v56 = vadd.f32 %v1324_v39, %v120_v55 }
  0xad   :  { %v321_v16 = vpop.permute.xlu1 %320 }
  0xae   :  { %v138_v57 = vmul.f32 0.01, %v121_v56  ;;  %vm132_vm4 = vcmp.ge.f32.partialorder %v121_v56, 0.0  ;;  %v344_v17 = vmul.f32 %v1664_v15, %v321_v16 }
  0xb0   :  { %v144_v58 = vsel %vm132_vm4, %v121_v56, %v138_v57 }
  0xb1   :  { %1220 = vmatmul.msk.f32.gmra.mxu1 %vm75_vm0, %v144_v58  ;;  %1226 = vmatmul.msk.f32.gmra.mxu2 %vm75_vm0, %v144_v58 }
  0xb3   :  { %v123_v59 = vpop.f32.mrf.mxu0 }
  0xb4   :  { %v124_v60 = vadd.f32 %v1324_v39, %v123_v59 }
  0xb5   :  { %v1690_v38 = vpop.permute.xlu1 %315 }
  0xb6   :  { %v139_v61 = vmul.f32 0.01, %v124_v60  ;;  %vm133_vm5 = vcmp.ge.f32.partialorder %v124_v60, 0.0 }
  0xb8   :  { %v145_v62 = vsel %vm133_vm5, %v124_v60, %v139_v61 }
  0xb9   :  { %1221 = vmatmul.msk.f32.gmra.mxu1 %vm75_vm0, %v145_v62  ;;  %1227 = vmatmul.msk.f32.gmra.mxu2 %vm75_vm0, %v145_v62 }
  0xbb   :  { %v126_v63 = vpop.f32.mrf.mxu0 }
  0xbc   :  { %v127_v0 = vadd.f32 %v1324_v39, %v126_v63  ;;  %v1692_v39 = vpop.permute.xlu0 %268 }
  0xbd   :  { %vm285_vm8 = vcmp.eq.s32.totalorder %v1696_v47, %v1692_v39 }
  0xbe   :  { %v140_v1 = vmul.f32 0.01, %v127_v0  ;;  %vm134_vm6 = vcmp.ge.f32.partialorder %v127_v0, 0.0 }
  0xc0   :  { %v146_v2 = vsel %vm134_vm6, %v127_v0, %v140_v1 }
  0xc1   :  { %1222 = vmatmul.msk.f32.gmra.mxu1 %vm75_vm0, %v146_v2  ;;  %1228 = vmatmul.msk.f32.gmra.mxu2 %vm75_vm0, %v146_v2 }
  0xc4   :  { %v1694_v42 = vpop.permute.xlu0 %271 }
  0xc5   :  { %vm286_vm9 = vcmp.eq.s32.totalorder %v1696_v47, %v1694_v42 }
 0x116   :  { %v194_v13 = vpop.f32.mrf.mxu1 }
 0x117   :  { %v1658_v14 = vadd.f32 %v1326_v12, %v194_v13 }
 0x119   :  { %767 = vperm.xlu2 %1282, %v1658_v14  }
 0x11e   :  { %v197_v18 = vpop.f32.mrf.mxu1 }
 0x11f   :  { %v198_v19 = vadd.f32 %v1326_v12, %v197_v18 }
 0x121   :  { %362 = vperm.xlu1 %1280, %v198_v19   ;;  %1283 = vset.pattern.permute.xlu2 %v1439_v11  ;;  %v1668_v20 = vadd.f32 %v344_v17, %v198_v19 }
 0x122   :  { %357 = vperm.xlu2 %1283, %v1658_v14  }
 0x126   :  { %v200_v22 = vpop.f32.mrf.mxu1 }
 0x127   :  { %v201_v23 = vadd.f32 %v1326_v12, %v200_v22 }
 0x129   :  { %367 = vperm.xlu1 %1280, %v201_v23   ;;  %v1672_v24 = vadd.f32 %v345_v21, %v201_v23 }
 0x12a   :  { %1284 = vset.pattern.permute.xlu2 %v1440_v7 }
 0x12b   :  { %771 = vperm.xlu2 %1284, %v198_v19  }
 0x12e   :  { %v203_v26 = vpop.f32.mrf.mxu1 }
 0x12f   :  { %v204_v27 = vadd.f32 %v1326_v12, %v203_v26 }
 0x131   :  { %779 = vperm.xlu0 %1285, %v204_v27   ;;  %372 = vperm.xlu1 %1280, %v204_v27   ;;  %v1675_v28 = vadd.f32 %v346_v25, %v204_v27 }
 0x133   :  { %775 = vperm.xlu2 %1284, %v201_v23  }
 0x136   :  { %v206_v29 = vpop.f32.mrf.mxu1 }
 0x137   :  { %v1677_v30 = vadd.f32 %v1326_v12, %v206_v29 }
 0x139   :  { %783 = vperm.xlu0 %1285, %v1677_v30   ;;  %1287 = vset.pattern.permute.xlu1 %v1440_v7 }
 0x13b   :  { %1286 = vset.pattern.permute.xlu2 %v1439_v11 }
 0x13c   :  { %377 = vperm.xlu2 %1286, %v1677_v30  }
 0x13e   :  { %v209_v32 = vpop.f32.mrf.mxu1 }
 0x13f   :  { %v210_v33 = vadd.f32 %v1326_v12, %v209_v32 }
 0x141   :  { %787 = vperm.xlu1 %1287, %v210_v33   ;;  %v1683_v34 = vadd.f32 %v348_v31, %v210_v33 }
 0x144   :  { %1290 = vset.pattern.permute.xlu2 %v1440_v7 }
 0x149   :  { %1288 = vset.pattern.permute.xlu1 %v1439_v11 }
 0x14a   :  { %382 = vperm.xlu1 %1288, %v210_v33  }
 0x152   :  { %1289 = vset.pattern.permute.xlu1 %v1440_v7 }
 0x173   :  { %v768_v37 = vpop.permute.xlu2 %767 }
 0x174   :  { %v790_v52 = vsel %vm285_vm8, %v768_v37, -1e+30 }
 0x175   :  { %v796_v59 = vsel %vm391_vm11, %v790_v52, -inf }
 0x17c   :  { %v358_v41 = vpop.permute.xlu2 %357 }
 0x17d   :  { %v385_v9 = vsel %vm285_vm8, %v358_v41, -1e+30 }
 0x17e   :  { %v392_v19 = vsel %vm391_vm11, %v385_v9, -inf }
 0x185   :  { %v772_v44 = vpop.permute.xlu2 %771 }
 0x186   :  { %v791_v53 = vsel %vm286_vm9, %v772_v44, -1e+30 }
 0x187   :  { %v797_v60 = vsel %vm391_vm11, %v791_v53, -inf }
 0x18d   :  { %v776_v49 = vpop.permute.xlu2 %775 }
 0x18e   :  { %v792_v57 = vsel %vm287_vm13, %v776_v49, -1e+30 }
 0x18f   :  { %v798_v2 = vsel %vm391_vm11, %v792_v57, -inf }
 0x193   :  { %v363_v40 = vpop.permute.xlu1 %362 }
 0x194   :  { %v386_v12 = vsel %vm286_vm9, %v363_v40, -1e+30 }
 0x195   :  { %v393_v23 = vsel %vm391_vm11, %v386_v12, -inf }
 0x196   :  { %v378_v63 = vpop.permute.xlu2 %377 }
 0x197   :  { %v389_v8 = vsel %vm289_vm7, %v378_v63, -1e+30 }
 0x198   :  { %v396_v16 = vsel %vm391_vm11, %v389_v8, -inf }
 0x199   :  { %v397_v29 = vmax.f32 %v392_v19, %v396_v16 }
 0x19b   :  { %v368_v43 = vpop.permute.xlu1 %367 }
 0x19c   :  { %v387_v21 = vsel %vm287_vm13, %v368_v43, -1e+30 }
 0x19d   :  { %v394_v32 = vsel %vm391_vm11, %v387_v21, -inf }
 0x1a3   :  { %v780_v45 = vpop.permute.xlu0 %779  ;;  %v373_v48 = vpop.permute.xlu1 %372 }
 0x1a4   :  { %v793_v54 = vsel %vm288_vm10, %v780_v45, -1e+30  ;;  %v388_v13 = vsel %vm288_vm10, %v373_v48, -1e+30  ;;  %v1441_v48 = vmov 0.0  }
 0x1a5   :  { %v799_v61 = vsel %vm391_vm11, %v793_v54, -inf  ;;  %v395_v25 = vsel %vm391_vm11, %v388_v13, -inf  ;;  %v1761_v49 = vsel %vm289_vm7, 1.0, %v1441_v48  ;;  %v1775_v4 = vsel %vm288_vm10, 1.0, %v1441_v48 }
 0x1a6   :  { %v805_v3 = vmax.f32 %v798_v2, %v799_v61  ;;  %v401_v37 = vmax.f32 %v394_v32, %v395_v25  ;;  %v1780_v5 = vsel %vm286_vm9, 1.0, %v1441_v48  ;;  %v1804_v8 = vsel %vm285_vm8, 1.0, %v1441_v48 }
 0x1a7   :  { %v347_v13 = vmul.f32 %v1664_v15, %v1688_v36  ;;  %v343_v32 = vmul.f32 %v1664_v15, %v1690_v38 }
 0x1a9   :  { %v1814_v16 = vadd.f32 %v347_v13, %v1677_v30 }
 0x1ab   :  { %v784_v50 = vpop.permute.xlu0 %783 }
 0x1ac   :  { %v794_v51 = vsel %vm289_vm7, %v784_v50, -1e+30  ;;  %v1766_v50 = vsel %vm290_vm12, 1.0, %v1441_v48 }
 0x1ad   :  { %v800_v55 = vsel %vm391_vm11, %v794_v51, -inf }
 0x1ae   :  { %v801_v0 = vmax.f32 %v796_v59, %v800_v55 }
 0x1b3   :  { %v788_v56 = vpop.permute.xlu1 %787 }
 0x1b4   :  { %v795_v58 = vsel %vm290_vm12, %v788_v56, -1e+30 }
 0x1b5   :  { %v802_v62 = vsel %vm391_vm11, %v795_v58, -inf }
 0x1b6   :  { %v803_v1 = vmax.f32 %v797_v60, %v802_v62 }
 0x1b8   :  { %v804_v7 = vmax.f32 %v801_v0, %v803_v1  ;;  %v1794_v0 = vsel %vm287_vm13, 1.0, %v1441_v48 }
 0x1ba   :  { %v806_v10 = vmax.f32 %v804_v7, %v805_v3 }
 0x1bc   :  { %v807_v17 = vrot.slane %v806_v10, 4  ;;  %v383_v18 = vpop.permute.xlu1 %382 }
 0x1bd   :  { %v390_v22 = vsel %vm290_vm12, %v383_v18, -1e+30 }
 0x1be   :  { %v808_v26 = vmax.f32 %v806_v10, %v807_v17  ;;  %v398_v27 = vsel %vm391_vm11, %v390_v22, -inf }
 0x1bf   :  { %v399_v31 = vmax.f32 %v393_v23, %v398_v27 }
 0x1c0   :  { %v809_v33 = vrot.slane %v808_v26, 2 }
 0x1c1   :  { %v400_v40 = vmax.f32 %v397_v29, %v399_v31 }
 0x1c2   :  { %v810_v41 = vmax.f32 %v808_v26, %v809_v33 }
 0x1c3   :  { %v402_v43 = vmax.f32 %v400_v40, %v401_v37  ;;  %v1834_v40 = vadd.f32 %v343_v32, %v1658_v14 }
 0x1c4   :  { %v811_v44 = vrot.slane %v810_v41, 1 }
 0x1c5   :  { %v403_v45 = vrot.slane %v402_v43, 4 }
 0x1c6   :  { %v812_v46 = vmax.f32 %v810_v41, %v811_v44 }
 0x1c7   :  { %v404_v51 = vmax.f32 %v402_v43, %v403_v45 }
 0x1c8   :  { %v818_v52 = vmul.f32 %v1766_v50, %v812_v46  ;;  %v817_v53 = vmul.f32 %v1761_v49, %v812_v46  ;;  %v816_v59 = vmul.f32 %v1775_v4, %v812_v46  ;;  %v814_v60 = vmul.f32 %v1780_v5, %v812_v46 }
 0x1c9   :  { %v405_v54 = vrot.slane %v404_v51, 2  ;;  %v815_v1 = vmul.f32 %v1794_v0, %v812_v46  ;;  %v813_v35 = vmul.f32 %v1804_v8, %v812_v46 }
 0x1ca   :  { %v834_v55 = vsel %vm391_vm11, %v818_v52, 0.0  ;;  %v831_v56 = vsel %vm391_vm11, %v817_v53, 0.0  ;;  %v828_v63 = vsel %vm391_vm11, %v816_v59, 0.0  ;;  %v822_v6 = vsel %vm391_vm11, %v814_v60, 0.0 }
 0x1cb   :  { %v406_v57 = vmax.f32 %v404_v51, %v405_v54  ;;  %835 = vadd.xlane.f32.xlu0 %v834_v55  ;;  %832 = vadd.xlane.f32.xlu2 %v831_v56  ;;  %v825_v3 = vsel %vm391_vm11, %v815_v1, 0.0  ;;  %v819_v9 = vsel %vm391_vm11, %v813_v35, 0.0  ;;  %v247_v55 = vpop.f32.mrf.mxu2 }
 0x1cd   :  { %v407_v58 = vrot.slane %v406_v57, 1 }
 0x1cf   :  { %v1784_v61 = vmax.f32 %v406_v57, %v407_v58 }
 0x1d1   :  { %v414_v62 = vmul.f32 %v1766_v50, %v1784_v61  ;;  %v413_v2 = vmul.f32 %v1761_v49, %v1784_v61  ;;  %v412_v10 = vmul.f32 %v1775_v4, %v1784_v61  ;;  %v410_v14 = vmul.f32 %v1780_v5, %v1784_v61 }
 0x1d2   :  { %v411_v51 = vmul.f32 %v1794_v0, %v1784_v61  ;;  %v409_v52 = vmul.f32 %v1804_v8, %v1784_v61  ;;  %v1327_v61 = vld [vmem:[%s2165_s9] ss:$0 sm:$0xff]  ;;  %s1444_s9 = smov 1  }
 0x1d3   :  { %829 = vadd.xlane.f32.xlu0 %v828_v63  ;;  %823 = vadd.xlane.f32.xlu2 %v822_v6  ;;  %v430_v42 = vsel %vm391_vm11, %v414_v62, 0.0  ;;  %v427_v7 = vsel %vm391_vm11, %v413_v2, 0.0  ;;  %v424_v12 = vsel %vm391_vm11, %v412_v10, 0.0  ;;  %v418_v48 = vsel %vm391_vm11, %v410_v14, 0.0  ;;  %v250_v56 = vpop.f32.mrf.mxu2 }
 0x1d4   :  { %431 = vadd.xlane.f32.xlu1 %v430_v42  ;;  %v421_v54 = vsel %vm391_vm11, %v411_v51, 0.0 }
 0x1db   :  { %826 = vadd.xlane.f32.xlu0 %v825_v3  ;;  %428 = vadd.xlane.f32.xlu2 %v427_v7  ;;  %v253_v57 = vpop.f32.mrf.mxu2 }
 0x1dc   :  { %v1863_v63 = vadd.f32 %v1327_v61, %v253_v57 }
 0x1e3   :  { %820 = vadd.xlane.f32.xlu0 %v819_v9  ;;  %v256_v60 = vpop.f32.mrf.mxu2  ;;  %v241_v9 = vpop.f32.mrf.mxu0 }
 0x1e4   :  { %v1865_v6 = vadd.f32 %v1327_v61, %v256_v60 }
 0x1eb   :  { %425 = vadd.xlane.f32.xlu0 %v424_v12 }
 0x23e   :  { %v836_v39 = vpop.xlane.xlu0 %835  ;;  %v833_v47 = vpop.xlane.xlu2 %832 }
 0x23f   :  { %v842_v17 = vsub.f32 %v1683_v34, %v836_v39  ;;  %v841_v18 = vsub.f32 %v1814_v16, %v833_v47  ;;  %v1875_v47 = vadd.f32 %v1327_v61, %v247_v55 }
 0x241   :  { %v853_v19 = vmul.f32 1.442695, %v842_v17  ;;  %v851_v21 = vmul.f32 1.442695, %v841_v18  ;;  %v1877_v17 = vadd.f32 %v1327_v61, %v250_v56 }
 0x243   :  { %1328 = vpow2.f32 %v853_v19 }
 0x244   :  { %1330 = vpow2.f32 %v851_v21 }
 0x246   :  { %v830_v22 = vpop.xlane.xlu0 %829  ;;  %v824_v27 = vpop.xlane.xlu2 %823 }
 0x247   :  { %v840_v23 = vsub.f32 %v1675_v28, %v830_v22  ;;  %v838_v37 = vsub.f32 %v1668_v20, %v824_v27  ;;  %v432_v59 = vpop.xlane.xlu1 %431 }
 0x248   :  { %v438_v13 = vsub.f32 %v1683_v34, %v432_v59  ;;  %v1885_v34 = vadd.f32 %v1327_v61, %v241_v9 }
 0x249   :  { %v1819_v25 = vpop.eup %1328  ;;  %v849_v26 = vmul.f32 1.442695, %v840_v23  ;;  %v845_v41 = vmul.f32 1.442695, %v838_v37 }
 0x24a   :  { %v1821_v36 = vpop.eup %1330  ;;  %882 = vperm.xlu1 %1289, %v1819_v25   ;;  %v449_v21 = vmul.f32 1.442695, %v438_v13 }
 0x24b   :  { %1332 = vpow2.f32 %v849_v26  ;;  %877 = vperm.xlu2 %1290, %v1821_v36   ;;  %v1291_v53 = vpack.i.bf16 %v1821_v36, %v1819_v25  ;;  %v244_v26 = vpop.f32.mrf.mxu0 }
 0x24e   :  { %v827_v30 = vpop.xlane.xlu0 %826  ;;  %v429_v58 = vpop.xlane.xlu2 %428 }
 0x24f   :  { %v839_v29 = vsub.f32 %v1672_v24, %v827_v30  ;;  %v437_v7 = vsub.f32 %v1814_v16, %v429_v58  ;;  %v1887_v30 = vadd.f32 %v1327_v61, %v244_v26 }
 0x251   :  { %v1826_v31 = vpop.eup %1332  ;;  %v847_v33 = vmul.f32 1.442695, %v839_v29  ;;  %v447_v10 = vmul.f32 1.442695, %v437_v7 }
 0x252   :  { %872 = vperm.xlu0 %1285, %v1826_v31  }
 0x253   :  { %1334 = vpow2.f32 %v847_v33  ;;  %1321 = vset.pattern.permute.xlu2 %v1439_v11 }
 0x254   :  { %1336 = vpow2.f32 %v845_v41 }
 0x256   :  { %v821_v43 = vpop.xlane.xlu0 %820 }
 0x257   :  { %v837_v44 = vsub.f32 %v1834_v40, %v821_v43 }
 0x259   :  { %v1837_v45 = vpop.eup %1334  ;;  %v843_v46 = vmul.f32 1.442695, %v837_v44 }
 0x25a   :  { %867 = vperm.xlu1 %1289, %v1837_v45   ;;  %v1840_v15 = vpop.eup %1336  ;;  %v1301_v12 = vpack.i.bf16 %v1837_v45, %v1826_v31 }
 0x25b   :  { %1338 = vpow2.f32 %v843_v46 }
 0x25c   :  { %1340 = vpow2.f32 %v447_v10 }
 0x25d   :  { %1342 = vpow2.f32 %v449_v21 }
 0x25e   :  { %v426_v35 = vpop.xlane.xlu0 %425 }
 0x25f   :  { %v436_v43 = vsub.f32 %v1675_v28, %v426_v35 }
 0x261   :  { %v1842_v38 = vpop.eup %1338  ;;  %v445_v44 = vmul.f32 1.442695, %v436_v43 }
 0x262   :  { %862 = vperm.xlu1 %1289, %v1840_v15   ;;  %857 = vperm.xlu0 %1285, %v1842_v38   ;;  %v1881_v23 = vpop.eup %1340  ;;  %v1316_v46 = vpack.i.bf16 %v1842_v38, %v1840_v15 }
 0x263   :  { %v1891_v41 = vpop.eup %1342  ;;  %1344 = vpow2.f32 %v445_v44 }
 0x26a   :  { %1322 = vset.pattern.permute.xlu1 %v1439_v11  ;;  %1323 = vset.pattern.permute.xlu0 %v1439_v11  ;;  %v415_v11 = vsel %vm391_vm11, %v409_v52, 0.0 }
 0x274   :  { %419 = vadd.xlane.f32.xlu2 %v418_v48  ;;  %v1899_v48 = vpop.eup %1344 }
 0x28c   :  { %1292 = vrot.lane.b32.xlu2 %v1291_v53, %s1442_s7  ;;  %422 = vadd.xlane.f32.xlu1 %v421_v54 }
 0x28d   :  { %416 = vadd.xlane.f32.xlu0 %v415_v11 }
 0x2a5   :  { %v878_v62 = vpop.permute.xlu2 %877 }
 0x2a6   :  { %v889_v1 = vmul.f32 %v878_v62, %v1863_v63 }
 0x2bc   :  { %v883_v42 = vpop.permute.xlu1 %882 }
 0x2bd   :  { %v890_v2 = vmul.f32 %v883_v42, %v1865_v6 }
 0x2bf   :  { %v1296_v3 = vpack.i.bf16 %v889_v1, %v890_v2 }
 0x2c1   :  { %1297 = vrot.lane.b32.xlu1 %v1296_v3, %s1443_s4 }
 0x2c4   :  { %v873_v39 = vpop.permute.xlu0 %872 }
 0x2c5   :  { %v888_v19 = vmul.f32 %v873_v39, %v1877_v17 }
 0x2c9   :  { %1302 = vrot.lane.b32.xlu1 %v1301_v12, %s1442_s7 }
 0x2cc   :  { %v868_v18 = vpop.permute.xlu1 %867 }
 0x2cd   :  { %v887_v16 = vmul.f32 %v868_v18, %v1875_v47 }
 0x2cf   :  { %v1306_v22 = vpack.i.bf16 %v887_v16, %v888_v19 }
 0x2d1   :  { %1307 = vrot.lane.b32.xlu2 %v1306_v22, %s1443_s4  ;;  %473 = vperm.xlu1 %1322, %v1881_v23  }
 0x2d4   :  { %v863_v27 = vpop.permute.xlu1 %862  ;;  %v858_v29 = vpop.permute.xlu0 %857 }
 0x2d5   :  { %v886_v32 = vmul.f32 %v863_v27, %v1887_v30  ;;  %v885_v33 = vmul.f32 %v858_v29, %v1885_v34 }
 0x2d7   :  { %v1311_v37 = vpack.i.bf16 %v885_v33, %v886_v32 }
 0x2d9   :  { %478 = vperm.xlu2 %1321, %v1891_v41   ;;  %1312 = vrot.lane.b32.xlu0 %v1311_v37, %s1443_s4 }
 0x2e1   :  { %1317 = vrot.lane.b32.xlu0 %v1316_v46, %s1442_s7 }
 0x2e7   :  { %v420_v14 = vpop.xlane.xlu2 %419 }
 0x2e8   :  { %v434_v51 = vsub.f32 %v1668_v20, %v420_v14 }
 0x2e9   :  { %468 = vperm.xlu0 %1323, %v1899_v48  }
 0x2ea   :  { %v441_v52 = vmul.f32 1.442695, %v434_v51 }
 0x2ec   :  { %1346 = vpow2.f32 %v441_v52 }
 0x2ef   :  { %v1293_v59 = vpop.permute.xlu2 %1292 }
 0x2f0   :  { %v1294_v12 = vunpack.i.l.bf16 %v1293_v59  ;;  %v1295_v13 = vunpack.i.h.bf16 %v1293_v59 }
 0x2f2   :  { %v1903_v53 = vpop.eup %1346 }
 0x2f3   :  { %458 = vperm.xlu1 %1322, %v1903_v53  }
 0x2ff   :  { %v423_v28 = vpop.xlane.xlu1 %422 }
 0x300   :  { %v435_v54 = vsub.f32 %v1672_v24, %v423_v28  ;;  %v417_v11 = vpop.xlane.xlu0 %416 }
 0x301   :  { %v433_v55 = vsub.f32 %v1834_v40, %v417_v11 }
 0x302   :  { %v443_v56 = vmul.f32 1.442695, %v435_v54 }
 0x303   :  { %v439_v57 = vmul.f32 1.442695, %v433_v55 }
 0x304   :  { %1348 = vpow2.f32 %v443_v56 }
 0x305   :  { %1350 = vpow2.f32 %v439_v57 }
 0x30a   :  { %v1908_v58 = vpop.eup %1348 }
 0x30b   :  { %v1910_v20 = vpop.eup %1350  ;;  %463 = vperm.xlu2 %1321, %v1908_v58  }
 0x30c   :  { %453 = vperm.xlu1 %1322, %v1910_v20  }
 0x32b   :  { %v1308_v60 = vpop.permute.xlu2 %1307 }
 0x32c   :  { %v1309_v1 = vunpack.i.l.bf16 %v1308_v60  ;;  %v1310_v2 = vunpack.i.h.bf16 %v1308_v60 }
 0x331   :  { %487 = vxpose.xlu2.b32.start [1/6] (short) (narrow) %v1804_v8, 16 }
 0x333   :  { %v1298_v24 = vpop.permute.xlu1 %1297  ;;  %v479_v61 = vpop.permute.xlu2 %478 }
 0x334   :  { %v1299_v62 = vunpack.i.l.bf16 %v1298_v24  ;;  %v486_v40 = vmul.f32 %v479_v61, %v1865_v6  ;;  %v1300_v42 = vunpack.i.h.bf16 %v1298_v24 }
 0x336   :  { %536 = vmatpush.msra.mxu3 %v486_v40  ;;  %925 = vmatpush.msra.mxu0 %v1299_v62 }
 0x337   :  { %1263 = vmatpush.msrb.mxu1 %v1299_v62 }
 0x338   :  { %926 = vmatpush.msra.mxu0 %v1300_v42 }
 0x339   :  { %1264 = vmatpush.msrb.mxu1 %v1300_v42  ;;  %488 = vxpose.xlu2.b32.cont [2/6] (short) (narrow) %v1780_v5, 16 }
 0x33a   :  { %927 = vmatpush.msra.mxu0 %v1309_v1 }
 0x33b   :  { %1265 = vmatpush.msrb.mxu1 %v1309_v1  ;;  %v1303_v3 = vpop.permute.xlu1 %1302 }
 0x33c   :  { %928 = vmatpush.msra.mxu0 %v1310_v2  ;;  %v1304_v39 = vunpack.i.l.bf16 %v1303_v3  ;;  %v1305_v19 = vunpack.i.h.bf16 %v1303_v3 }
 0x33d   :  { %1266 = vmatpush.msrb.mxu1 %v1310_v2 }
 0x341   :  { %489 = vxpose.xlu2.b32.cont [3/6] (short) (narrow) %v1794_v0, 16 }
 0x343   :  { %v474_v7 = vpop.permute.xlu1 %473 }
 0x344   :  { %v485_v6 = vmul.f32 %v474_v7, %v1863_v63 }
 0x346   :  { %537 = vmatpush.msra.mxu3 %v485_v6 }
 0x349   :  { %490 = vxpose.xlu2.b32.cont [4/6] (short) (narrow) %v1775_v4, 16 }
 0x34b   :  { %v1313_v35 = vpop.permute.xlu0 %1312 }
 0x34c   :  { %v1314_v9 = vunpack.i.l.bf16 %v1313_v35  ;;  %v1315_v10 = vunpack.i.h.bf16 %v1313_v35 }
 0x34e   :  { %929 = vmatpush.msra.mxu0 %v1314_v9  ;;  %1267 = vmatpush.msrb.mxu1 %v1314_v9 }
 0x350   :  { %930 = vmatpush.msra.mxu0 %v1315_v10  ;;  %1268 = vmatpush.msrb.mxu1 %v1315_v10 }
 0x351   :  { %491 = vxpose.xlu2.b32.cont [5/6] (short) (narrow) %v1761_v49, 16 }
 0x352   :  { %966 = vmatpush.msra.mxu1 %v1294_v12 }
 0x353   :  { %v1318_v18 = vpop.permute.xlu0 %1317 }
 0x354   :  { %967 = vmatpush.msra.mxu1 %v1295_v13  ;;  %v1319_v63 = vunpack.i.l.bf16 %v1318_v18  ;;  %v1320_v16 = vunpack.i.h.bf16 %v1318_v18 }
 0x356   :  { %968 = vmatpush.msra.mxu1 %v1304_v39 }
 0x358   :  { %969 = vmatpush.msra.mxu1 %v1305_v19 }
 0x359   :  { %492 = vxpose.xlu2.b32.end [6/6] (short) (narrow) %v1766_v50, 16 }
 0x35a   :  { %970 = vmatpush.msra.mxu1 %v1319_v63 }
 0x35b   :  { %v469_v21 = vpop.permute.xlu0 %468 }
 0x35c   :  { %971 = vmatpush.msra.mxu1 %v1320_v16  ;;  %v484_v22 = vmul.f32 %v469_v21, %v1877_v17 }
 0x35e   :  { %538 = vmatpush.msra.mxu3 %v484_v22 }
 0x365   :  { %v459_v26 = vpop.permute.xlu1 %458  ;;  %v464_v27 = vpop.permute.xlu2 %463 }
 0x366   :  { %v483_v29 = vmul.f32 %v464_v27, %v1875_v47  ;;  %v482_v32 = vmul.f32 %v459_v26, %v1887_v30 }
 0x368   :  { %539 = vmatpush.msra.mxu3 %v483_v29 }
 0x36a   :  { %540 = vmatpush.msra.mxu3 %v482_v32 }
 0x37e   :  { %v454_v33 = vpop.permute.xlu1 %453 }
 0x37f   :  { %v481_v37 = vmul.f32 %v454_v33, %v1885_v34 }
 0x381   :  { %541 = vmatpush.msra.mxu3 %v481_v37 }
 0x383   :  { %559 = vmatpush.msrb.mxu3 %v1891_v41 }
 0x385   :  { %560 = vmatpush.msrb.mxu3 %v1881_v23 }
 0x387   :  { %561 = vmatpush.msrb.mxu3 %v1899_v48 }
 0x389   :  { %562 = vmatpush.msrb.mxu3 %v1908_v58 }
 0x38b   :  { %563 = vmatpush.msrb.mxu3 %v1903_v53 }
 0x38d   :  { %564 = vmatpush.msrb.mxu3 %v1910_v20 }
 0x3ca   :  { %v503_v47 = vpop.trf.xlu2 }
 0x3cb   :  { %1235 = vmatmul.msk.f32.vlgmr.msra.gmra.mxu3 %vm519_vm14, %v503_v47  ;;  %1245 = vmatmul.msk.f32.vlgmr.msra.gmra.mxu0 %vm519_vm14, %v503_v47 }
 0x3d2   :  { %v504_v17 = vpop.trf.xlu2 }
 0x3d3   :  { %1236 = vmatmul.msk.f32.gmra.mxu3 %vm519_vm14, %v504_v17  ;;  %1246 = vmatmul.msk.f32.vlgmr.msrb.gmra.mxu1 %vm519_vm14, %v504_v17 }
 0x3db   :  { %1237 = vmatmul.msk.f32.vlgmr.msrb.gmra.mxu3 %vm519_vm14, %v503_v47  ;;  %1247 = vmatmul.msk.f32.vlgmr.msra.gmra.mxu1 %vm519_vm14, %v503_v47 }
 0x3e3   :  { %1238 = vmatmul.msk.f32.gmra.mxu3 %vm519_vm14, %v504_v17  ;;  %1248 = vmatmul.msk.f32.gmra.mxu1 %vm519_vm14, %v504_v17 }
 0x44e   :  { %v1932_v34 = vpop.f32.mrf.mxu3 }
 0x450   :  { %v1934_v30 = vpop.f32.mrf.mxu1 }
 0x456   :  { %v1936_v43 = vpop.f32.mrf.mxu3 }
 0x458   :  { %v973_v44 = vpop.f32.mrf.mxu1 }
 0x459   :  { %v1967_v57 = vadd.f32 1e-10, %v973_v44 }
 0x45e   :  { %v566_v46 = vpop.f32.mrf.mxu3 }
 0x45f   :  { %v1963_v28 = vadd.f32 1e-10, %v566_v46 }
 0x460   :  { %v976_v14 = vpop.f32.mrf.mxu1 }
 0x461   :  { %1037 = vmatpush.msrb.mxu2 %v976_v14  ;;  %v1981_v39 = vadd.f32 1e-10, %v976_v14  ;;  %vm579_vm10 = vweird.f32 %v1963_v28 }
 0x463   :  { %1038 = vmatpush.msrb.mxu2 %v973_v44 }
 0x464   :  { %1249 = vmatmul.msk.f32.vlgmr.msrb.gmra.mxu2 %vm391_vm11, %v1804_v8 }
 0x466   :  { %v569_v51 = vpop.f32.mrf.mxu3 }
 0x467   :  { %648 = vmatpush.msra.mxu3 %v569_v51  ;;  %v1969_v24 = vadd.f32 1e-10, %v569_v51 }
 0x469   :  { %649 = vmatpush.msra.mxu3 %v566_v46 }
 0x46a   :  { %1239 = vmatmul.msk.f32.vlgmr.msra.gmra.mxu3 %vm391_vm11, %v1804_v8 }
 0x46c   :  { %1250 = vmatmul.msk.f32.gmra.mxu2 %vm391_vm11, %v1780_v5 }
 0x472   :  { %1240 = vmatmul.msk.f32.gmra.mxu3 %vm391_vm11, %v1780_v5 }
 0x474   :  { %1251 = vmatmul.msk.f32.gmra.mxu2 %vm391_vm11, %v1794_v0 }
 0x47a   :  { %1241 = vmatmul.msk.f32.gmra.mxu3 %vm391_vm11, %v1794_v0 }
 0x47c   :  { %1252 = vmatmul.msk.f32.gmra.mxu2 %vm391_vm11, %v1775_v4 }
 0x482   :  { %1242 = vmatmul.msk.f32.gmra.mxu3 %vm391_vm11, %v1775_v4 }
 0x484   :  { %1253 = vmatmul.msk.f32.gmra.mxu2 %vm391_vm11, %v1761_v49 }
 0x48a   :  { %1243 = vmatmul.msk.f32.gmra.mxu3 %vm391_vm11, %v1761_v49 }
 0x48c   :  { %1254 = vmatmul.msk.f32.gmra.mxu2 %vm391_vm11, %v1766_v50 }
 0x492   :  { %1244 = vmatmul.msk.f32.gmra.mxu3 %vm391_vm11, %v1766_v50  ;;  %vm986_vm11 = vweird.f32 %v1967_v57 }
 0x4e7   :  { %v1040_v5 = vpop.f32.mrf.mxu2 }
 0x4e8   :  { %v1041_v0 = vadd.f32 1e-10, %v1040_v5 }
 0x4ea   :  { %1064 = vrot.lane.b32.xlu0 %v1041_v0, %s1444_s9 }
 0x4ed   :  { %v651_v8 = vpop.f32.mrf.mxu3 }
 0x4ee   :  { %v652_v52 = vadd.f32 1e-10, %v651_v8 }
 0x4ef   :  { %v1043_v4 = vpop.f32.mrf.mxu2 }
 0x4f0   :  { %1352 = vrcp.f32 %v652_v52  ;;  %v1044_v54 = vadd.f32 1e-10, %v1043_v4  ;;  %v680_v61 = vand.u32 2147483648, %v652_v52  ;;  %v678_v42 = vand.u32 2147483647, %v652_v52 }
 0x4f1   :  { %1354 = vrcp.f32 %v1963_v28  ;;  %vm674_vm0 = vweird.f32 %v652_v52 }
 0x4f2   :  { %1066 = vrot.lane.b32.xlu1 %v1044_v54, %s1444_s9  ;;  %v681_v7 = vor.u32 1.1754944e-38, %v680_v61  ;;  %vm679_vm2 = vcmp.eq.f32.partialorder %v678_v42, 8.507059e+37 }
 0x4f5   :  { %v654_v49 = vpop.f32.mrf.mxu3 }
 0x4f6   :  { %v1353_v11 = vpop.eup %1352  ;;  %v655_v55 = vadd.f32 1e-10, %v654_v49 }
 0x4f7   :  { %v670_v50 = vmul.f32 %v1353_v11, %v652_v52  ;;  %v1046_v56 = vpop.f32.mrf.mxu2  ;;  %v1971_v62 = vpop.eup %1354  ;;  %vm675_vm15 = vweird.f32 %v1353_v11 }
 0x4f8   :  { %1356 = vrcp.f32 %v655_v55  ;;  %v1047_v60 = vadd.f32 1e-10, %v1046_v56  ;;  %vm676_vm1 = vmor %vm674_vm0, %vm675_vm15  ;;  %v575_v35 = vmul.f32 %v1971_v62, %v1963_v28  ;;  %v695_v21 = vand.u32 2147483648, %v655_v55 }
 0x4f9   :  { %v671_v59 = vsub.f32 1.0, %v670_v50  ;;  %1358 = vrcp.f32 %v1967_v57  ;;  %v693_v27 = vand.u32 2147483647, %v655_v55  ;;  %vm689_vm5 = vweird.f32 %v655_v55 }
 0x4fa   :  { %1068 = vrot.lane.b32.xlu0 %v1047_v60, %s1444_s9  ;;  %1360 = vrcp.f32 %v1969_v24  ;;  %v576_v22 = vsub.f32 1.0, %v575_v35  ;;  %v696_v47 = vor.u32 1.1754944e-38, %v695_v21  ;;  %vm580_vm8 = vweird.f32 %v1971_v62 }
 0x4fb   :  { %v672_v40 = vmul.f32 %v1353_v11, %v671_v59  ;;  %vm694_vm7 = vcmp.eq.f32.partialorder %v693_v27, 8.507059e+37  ;;  %v583_v59 = vand.u32 2147483647, %v1963_v28  ;;  %v585_v60 = vand.u32 2147483648, %v1963_v28  ;;  %vm2022_vm13 = vmor %vm579_vm10, %vm580_vm8 }
 0x4fc   :  { %v577_v44 = vmul.f32 %v1971_v62, %v576_v22 }
 0x4fd   :  { %v673_v1 = vadd.f32 %v1353_v11, %v672_v40  ;;  %v657_v2 = vpop.f32.mrf.mxu3 }
 0x4fe   :  { %v1357_v3 = vpop.eup %1356  ;;  %v1976_v6 = vadd.f32 1e-10, %v657_v2 }
 0x4ff   :  { %v677_v9 = vsel %vm676_vm1, %v1353_v11, %v673_v1  ;;  %v685_v10 = vmul.f32 %v1357_v3, %v655_v55  ;;  %v1049_v12 = vpop.f32.mrf.mxu2  ;;  %v1984_v16 = vpop.eup %1358  ;;  %vm690_vm4 = vweird.f32 %v1357_v3  ;;  %v578_v11 = vadd.f32 %v1971_v62, %v577_v44 }
 0x500   :  { %v682_v13 = vsel %vm679_vm2, %v681_v7, %v677_v9  ;;  %1362 = vrcp.f32 %v1976_v6  ;;  %v1050_v63 = vadd.f32 1e-10, %v1049_v12  ;;  %v1991_v29 = vpop.eup %1360  ;;  %v982_v33 = vmul.f32 %v1984_v16, %v1967_v57  ;;  %vm691_vm6 = vmor %vm689_vm5, %vm690_vm4 }
 0x501   :  { %v683_v18 = vmul.f32 %v1910_v20, %v682_v13  ;;  %v686_v19 = vsub.f32 1.0, %v685_v10  ;;  %1364 = vrcp.f32 %v1981_v39  ;;  %v589_v5 = vmul.f32 %v1991_v29, %v1969_v24 }
 0x502   :  { %1070 = vrot.lane.b32.xlu1 %v1050_v63, %s1444_s9  ;;  %v983_v54 = vsub.f32 1.0, %v982_v33  ;;  %v710_v49 = vand.u32 2147483648, %v1976_v6  ;;  %vm704_vm12 = vweird.f32 %v1976_v6  ;;  %vm987_vm14 = vweird.f32 %v1984_v16 }
 0x503   :  { %760 = vst.msk [vmem:[%s2168_s12] sm:$0xff] %vm759_vm3, %v683_v18  ;;  %v687_v26 = vmul.f32 %v1357_v3, %v686_v19  ;;  %v590_v56 = vsub.f32 1.0, %v589_v5  ;;  %v582_v7 = vsel %vm2022_vm13, %v1971_v62, %v578_v11  ;;  %vm584_vm1 = vcmp.eq.f32.partialorder %v583_v59, 8.507059e+37 }
 0x504   :  { %v984_v1 = vmul.f32 %v1984_v16, %v983_v54  ;;  %v711_v28 = vor.u32 1.1754944e-38, %v710_v49  ;;  %v586_v18 = vor.u32 1.1754944e-38, %v585_v60  ;;  %vm594_vm2 = vweird.f32 %v1991_v29 }
 0x505   :  { %v688_v20 = vadd.f32 %v1357_v3, %v687_v26  ;;  %v660_v32 = vpop.f32.mrf.mxu3  ;;  %v591_v12 = vmul.f32 %v1991_v29, %v590_v56  ;;  %vm593_vm5 = vweird.f32 %v1969_v24  ;;  %v599_v33 = vand.u32 2147483648, %v1969_v24 }
 0x506   :  { %v1363_v37 = vpop.eup %1362  ;;  %v1996_v17 = vadd.f32 1e-10, %v660_v32  ;;  %v985_v62 = vadd.f32 %v1984_v16, %v984_v1  ;;  %v587_v26 = vsel %vm584_vm1, %v586_v18, %v582_v7  ;;  %vm2064_vm8 = vmor %vm593_vm5, %vm594_vm2  ;;  %v990_v5 = vand.u32 2147483647, %v1967_v57 }
 0x507   :  { %v692_v46 = vsel %vm691_vm6, %v1357_v3, %v688_v20  ;;  %v700_v14 = vmul.f32 %v1363_v37, %v1976_v6  ;;  %v1052_v51 = vpop.f32.mrf.mxu2  ;;  %v2007_v55 = vpop.eup %1364  ;;  %vm705_vm9 = vweird.f32 %v1363_v37  ;;  %vm2056_vm6 = vmor %vm986_vm11, %vm987_vm14  ;;  %v600_v11 = vor.u32 1.1754944e-38, %v599_v33 }
 0x508   :  { %v697_v0 = vsel %vm694_vm7, %v696_v47, %v692_v46  ;;  %1366 = vrcp.f32 %v1996_v17  ;;  %v1053_v4 = vadd.f32 1e-10, %v1052_v51  ;;  %vm706_vm15 = vmor %vm704_vm12, %vm705_vm9  ;;  %v725_v22 = vand.u32 2147483648, %v1996_v17 }
 0x509   :  { %v698_v8 = vmul.f32 %v1903_v53, %v697_v0  ;;  %v701_v52 = vsub.f32 1.0, %v700_v14  ;;  %v708_v53 = vand.u32 2147483647, %v1976_v6  ;;  %v996_v6 = vmul.f32 %v2007_v55, %v1981_v39 }
 0x50a   :  { %1072 = vrot.lane.b32.xlu0 %v1053_v4, %s1444_s9  ;;  %v723_v32 = vand.u32 2147483647, %v1996_v17  ;;  %v992_v47 = vand.u32 2147483648, %v1967_v57  ;;  %vm719_vm7 = vweird.f32 %v1996_v17  ;;  %v597_v51 = vand.u32 2147483647, %v1969_v24 }
 0x50b   :  { %761 = vst.msk [vmem:[%s2168_s12 + $0x8] sm:$0xff] %vm759_vm3, %v698_v8  ;;  %v702_v50 = vmul.f32 %v1363_v37, %v701_v52  ;;  %vm709_vm0 = vcmp.eq.f32.partialorder %v708_v53, 8.507059e+37  ;;  %v997_v27 = vsub.f32 1.0, %v996_v6  ;;  %v726_v8 = vor.u32 1.1754944e-38, %v725_v22 }
 0x50c   :  { %vm724_vm10 = vcmp.eq.f32.partialorder %v723_v32, 8.507059e+37  ;;  %vm598_vm11 = vcmp.eq.f32.partialorder %v597_v51, 8.507059e+37  ;;  %vm991_vm12 = vcmp.eq.f32.partialorder %v990_v5, 8.507059e+37  ;;  %vm1001_vm13 = vweird.f32 %v2007_v55 }
 0x50d   :  { %v703_v61 = vadd.f32 %v1363_v37, %v702_v50  ;;  %v663_v40 = vpop.f32.mrf.mxu3  ;;  %v998_v4 = vmul.f32 %v2007_v55, %v997_v27  ;;  %v993_v50 = vor.u32 1.1754944e-38, %v992_v47 }
 0x50e   :  { %v1367_v2 = vpop.eup %1366  ;;  %v2029_v3 = vadd.f32 1e-10, %v663_v40  ;;  %v1006_v40 = vand.u32 2147483648, %v1981_v39 }
 0x50f   :  { %v707_v35 = vsel %vm706_vm15, %v1363_v37, %v703_v61  ;;  %v715_v9 = vmul.f32 %v1367_v2, %v1996_v17  ;;  %v1055_v10 = vpop.f32.mrf.mxu2  ;;  %vm720_vm4 = vweird.f32 %v1367_v2  ;;  %v989_v17 = vsel %vm2056_vm6, %v1984_v16, %v985_v62 }
 0x510   :  { %v712_v13 = vsel %vm709_vm0, %v711_v28, %v707_v35  ;;  %1368 = vrcp.f32 %v2029_v3  ;;  %v1056_v21 = vadd.f32 1e-10, %v1055_v10  ;;  %vm721_vm9 = vmor %vm719_vm7, %vm720_vm4  ;;  %v740_v16 = vand.u32 2147483648, %v2029_v3 }
 0x511   :  { %v713_v19 = vmul.f32 %v1908_v58, %v712_v13  ;;  %v716_v63 = vsub.f32 1.0, %v715_v9  ;;  %v592_v58 = vadd.f32 %v1991_v29, %v591_v12  ;;  %v994_v60 = vsel %vm991_vm12, %v993_v50, %v989_v17 }
 0x512   :  { %1074 = vrot.lane.b32.xlu1 %v1056_v21, %s1444_s9  ;;  %604 = vperm.xlu0 %1323, %v587_v26   ;;  %v738_v61 = vand.u32 2147483647, %v2029_v3  ;;  %vm1000_vm15 = vweird.f32 %v1981_v39  ;;  %vm734_vm0 = vweird.f32 %v2029_v3  ;;  %v741_v7 = vor.u32 1.1754944e-38, %v740_v16 }
 0x513   :  { %762 = vst.msk [vmem:[%s2168_s12 + $0x10] sm:$0xff] %vm759_vm3, %v713_v19  ;;  %v717_v20 = vmul.f32 %v1367_v2, %v716_v63  ;;  %v596_v24 = vsel %vm2064_vm8, %v1991_v29, %v592_v58  ;;  %vm2091_vm1 = vmor %vm1000_vm15, %vm1001_vm13  ;;  %v1007_v12 = vor.u32 1.1754944e-38, %v1006_v40 }
 0x514   :  { %v601_v59 = vsel %vm598_vm11, %v600_v11, %v596_v24  ;;  %vm739_vm4 = vcmp.eq.f32.partialorder %v738_v61, 8.507059e+37 }
 0x515   :  { %v718_v44 = vadd.f32 %v1367_v2, %v717_v20  ;;  %v666_v46 = vpop.f32.mrf.mxu3 }
 0x516   :  { %v1369_v0 = vpop.eup %1368  ;;  %v667_v52 = vadd.f32 1e-10, %v666_v46 }
 0x517   :  { %v722_v54 = vsel %vm721_vm9, %v1367_v2, %v718_v44  ;;  %v730_v49 = vmul.f32 %v1369_v0, %v2029_v3  ;;  %vm735_vm14 = vweird.f32 %v1369_v0  ;;  %v1004_v2 = vand.u32 2147483647, %v1981_v39 }
 0x518   :  { %v727_v57 = vsel %vm724_vm10, %v726_v8, %v722_v54  ;;  %1370 = vrcp.f32 %v667_v52  ;;  %vm736_vm2 = vmor %vm734_vm0, %vm735_vm14  ;;  %v755_v18 = vand.u32 2147483648, %v667_v52  ;;  %v753_v63 = vand.u32 2147483647, %v667_v52 }
 0x519   :  { %v728_v53 = vmul.f32 %v1899_v48, %v727_v57  ;;  %v731_v56 = vsub.f32 1.0, %v730_v49  ;;  %v999_v48 = vadd.f32 %v2007_v55, %v998_v4  ;;  %vm1005_vm5 = vcmp.eq.f32.partialorder %v1004_v2, 8.507059e+37 }
 0x51a   :  { %609 = vperm.xlu1 %1322, %v601_v59   ;;  %1011 = vperm.xlu0 %1323, %v994_v60   ;;  %vm749_vm7 = vweird.f32 %v667_v52  ;;  %vm754_vm9 = vcmp.eq.f32.partialorder %v753_v63, 8.507059e+37  ;;  %vm1172_vm14 = vcmask 15368  }
 0x51b   :  { %763 = vst.msk [vmem:[%s2168_s12 + $0x18] sm:$0xff] %vm759_vm3, %v728_v53  ;;  %v732_v29 = vmul.f32 %v1369_v0, %v731_v56  ;;  %v1003_v9 = vsel %vm2091_vm1, %v2007_v55, %v999_v48  ;;  %v756_v55 = vor.u32 1.1754944e-38, %v755_v18 }
 0x51c   :  { %v1008_v19 = vsel %vm1005_vm5, %v1007_v12, %v1003_v9 }
 0x51d   :  { %v733_v42 = vadd.f32 %v1369_v0, %v732_v29 }
 0x51e   :  { %v1371_v28 = vpop.eup %1370 }
 0x51f   :  { %v737_v6 = vsel %vm736_vm2, %v1369_v0, %v733_v42  ;;  %v745_v35 = vmul.f32 %v1371_v28, %v667_v52  ;;  %vm750_vm6 = vweird.f32 %v1371_v28 }
 0x520   :  { %v742_v10 = vsel %vm739_vm4, %v741_v7, %v737_v6  ;;  %vm751_vm8 = vmor %vm749_vm7, %vm750_vm6 }
 0x521   :  { %v743_v3 = vmul.f32 %v1881_v23, %v742_v10  ;;  %v746_v13 = vsub.f32 1.0, %v745_v35 }
 0x522   :  { %1016 = vperm.xlu1 %1322, %v1008_v19  }
 0x523   :  { %764 = vst.msk [vmem:[%s2168_s12 + $0x20] sm:$0xff] %vm759_vm3, %v743_v3  ;;  %v747_v39 = vmul.f32 %v1371_v28, %v746_v13 }
 0x525   :  { %v748_v21 = vadd.f32 %v1371_v28, %v747_v39 }
 0x527   :  { %v752_v62 = vsel %vm751_vm8, %v1371_v28, %v748_v21 }
 0x528   :  { %v757_v23 = vsel %vm754_vm9, %v756_v55, %v752_v62 }
 0x529   :  { %v758_v22 = vmul.f32 %v1891_v41, %v757_v23 }
 0x52b   :  { %765 = vst.msk [vmem:[%s2168_s12 + $0x28] sm:$0xff] %vm759_vm3, %v758_v22 }
 0x55c   :  { %v1065_v26 = vpop.permute.xlu0 %1064 }
 0x55d   :  { %1372 = vrcp.f32 %v1065_v26  ;;  %v1093_v33 = vand.u32 2147483648, %v1065_v26  ;;  %v1091_v47 = vand.u32 2147483647, %v1065_v26  ;;  %vm1087_vm11 = vweird.f32 %v1065_v26 }
 0x55f   :  { %v1094_v41 = vor.u32 1.1754944e-38, %v1093_v33  ;;  %vm1092_vm13 = vcmp.eq.f32.partialorder %v1091_v47, 8.507059e+37 }
 0x563   :  { %v1373_v27 = vpop.eup %1372 }
 0x564   :  { %v1083_v20 = vmul.f32 %v1373_v27, %v1065_v26  ;;  %v1067_v32 = vpop.permute.xlu1 %1066  ;;  %vm1088_vm10 = vweird.f32 %v1373_v27 }
 0x565   :  { %1374 = vrcp.f32 %v1067_v32  ;;  %vm1089_vm12 = vmor %vm1087_vm11, %vm1088_vm10  ;;  %v1108_v17 = vand.u32 2147483648, %v1067_v32  ;;  %v1106_v54 = vand.u32 2147483647, %v1067_v32  ;;  %vm1102_vm15 = vweird.f32 %v1067_v32 }
 0x566   :  { %v1084_v58 = vsub.f32 1.0, %v1083_v20 }
 0x567   :  { %v1109_v57 = vor.u32 1.1754944e-38, %v1108_v17  ;;  %vm1107_vm1 = vcmp.eq.f32.partialorder %v1106_v54, 8.507059e+37 }
 0x568   :  { %v1085_v37 = vmul.f32 %v1373_v27, %v1084_v58 }
 0x56a   :  { %v1086_v44 = vadd.f32 %v1373_v27, %v1085_v37 }
 0x56b   :  { %v1375_v46 = vpop.eup %1374 }
 0x56c   :  { %v1090_v14 = vsel %vm1089_vm12, %v1373_v27, %v1086_v44  ;;  %v1098_v5 = vmul.f32 %v1375_v46, %v1067_v32  ;;  %v1069_v0 = vpop.permute.xlu0 %1068  ;;  %vm1103_vm3 = vweird.f32 %v1375_v46  ;;  %v932_v27 = vpop.f32.mrf.mxu0 }
 0x56d   :  { %v1095_v51 = vsel %vm1092_vm13, %v1094_v41, %v1090_v14  ;;  %1376 = vrcp.f32 %v1069_v0  ;;  %vm1104_vm0 = vmor %vm1102_vm15, %vm1103_vm3  ;;  %v1123_v59 = vand.u32 2147483648, %v1069_v0  ;;  %v1121_v29 = vand.u32 2147483647, %v1069_v0 }
 0x56e   :  { %v1096_v8 = vmul.f32 %v1842_v38, %v1095_v51  ;;  %v1099_v52 = vsub.f32 1.0, %v1098_v5  ;;  %vm1117_vm4 = vweird.f32 %v1069_v0 }
 0x56f   :  { %v1124_v40 = vor.u32 1.1754944e-38, %v1123_v59  ;;  %vm1122_vm6 = vcmp.eq.f32.partialorder %v1121_v29, 8.507059e+37 }
 0x570   :  { %1173 = vst.msk [vmem:[%s2168_s12] sm:$0xff] %vm1172_vm14, %v1096_v8  ;;  %v1100_v4 = vmul.f32 %v1375_v46, %v1099_v52  ;;  %v1181_v8 = vld [vmem:[%s2159_s3] sm:$0xff] }
 0x572   :  { %v1101_v49 = vadd.f32 %v1375_v46, %v1100_v4 }
 0x573   :  { %v1377_v24 = vpop.eup %1376 }
 0x574   :  { %v1105_v11 = vsel %vm1104_vm0, %v1375_v46, %v1101_v49  ;;  %v1113_v50 = vmul.f32 %v1377_v24, %v1069_v0  ;;  %v1071_v38 = vpop.permute.xlu1 %1070  ;;  %vm1118_vm2 = vweird.f32 %v1377_v24 }
 0x575   :  { %v1110_v53 = vsel %vm1107_vm1, %v1109_v57, %v1105_v11  ;;  %1378 = vrcp.f32 %v1071_v38  ;;  %vm1119_vm5 = vmor %vm1117_vm4, %vm1118_vm2  ;;  %v1138_v6 = vand.u32 2147483648, %v1071_v38  ;;  %v1136_v9 = vand.u32 2147483647, %v1071_v38 }
 0x576   :  { %v1111_v56 = vmul.f32 %v1840_v15, %v1110_v53  ;;  %v1114_v16 = vsub.f32 1.0, %v1113_v50  ;;  %vm1132_vm8 = vweird.f32 %v1071_v38  ;;  %vm1185_vm1 = vcmask 261120  }
 0x577   :  { %v1139_v3 = vor.u32 1.1754944e-38, %v1138_v6  ;;  %vm1137_vm10 = vcmp.eq.f32.partialorder %v1136_v9, 8.507059e+37 }
 0x578   :  { %1174 = vst.msk [vmem:[%s2168_s12 + $0x8] sm:$0xff] %vm1172_vm14, %v1111_v56  ;;  %v1115_v60 = vmul.f32 %v1377_v24, %v1114_v16 }
 0x57a   :  { %v1116_v61 = vadd.f32 %v1377_v24, %v1115_v60 }
 0x57b   :  { %v1379_v48 = vpop.eup %1378 }
 0x57c   :  { %v1120_v42 = vsel %vm1119_vm5, %v1377_v24, %v1116_v61  ;;  %v1128_v1 = vmul.f32 %v1379_v48, %v1071_v38  ;;  %v1073_v2 = vpop.permute.xlu0 %1072  ;;  %vm1133_vm7 = vweird.f32 %v1379_v48  ;;  %v1182_v38 = vld [vmem:[%s2159_s3 + $0x8] sm:$0xff] }
 0x57d   :  { %v1125_v15 = vsel %vm1122_vm6, %v1124_v40, %v1120_v42  ;;  %1380 = vrcp.f32 %v1073_v2  ;;  %vm1134_vm9 = vmor %vm1132_vm8, %vm1133_vm7  ;;  %v1153_v55 = vand.u32 2147483648, %v1073_v2  ;;  %v1151_v23 = vand.u32 2147483647, %v1073_v2 }
 0x57e   :  { %v1126_v28 = vmul.f32 %v1837_v45, %v1125_v15  ;;  %v1129_v7 = vsub.f32 1.0, %v1128_v1  ;;  %vm1147_vm12 = vweird.f32 %v1073_v2 }
 0x57f   :  { %v1154_v20 = vor.u32 1.1754944e-38, %v1153_v55  ;;  %vm1152_vm3 = vcmp.eq.f32.partialorder %v1151_v23, 8.507059e+37 }
 0x580   :  { %1175 = vst.msk [vmem:[%s2168_s12 + $0x10] sm:$0xff] %vm1172_vm14, %v1126_v28  ;;  %v1130_v35 = vmul.f32 %v1379_v48, %v1129_v7 }
 0x582   :  { %v1131_v10 = vadd.f32 %v1379_v48, %v1130_v35 }
 0x583   :  { %v1381_v12 = vpop.eup %1380 }
 0x584   :  { %v1135_v13 = vsel %vm1134_vm9, %v1379_v48, %v1131_v10  ;;  %v1143_v18 = vmul.f32 %v1381_v12, %v1073_v2  ;;  %v1075_v19 = vpop.permute.xlu1 %1074  ;;  %v605_v45 = vpop.permute.xlu0 %604  ;;  %vm1148_vm11 = vweird.f32 %v1381_v12 }
 0x585   :  { %v1140_v39 = vsel %vm1137_vm10, %v1139_v3, %v1135_v13  ;;  %1382 = vrcp.f32 %v1075_v19  ;;  %vm1149_vm13 = vmor %vm1147_vm12, %vm1148_vm11  ;;  %v612_v47 = vmul.f32 %v605_v45, %v1932_v34  ;;  %v1168_v14 = vand.u32 2147483648, %v1075_v19 }
 0x586   :  { %v1141_v63 = vmul.f32 %v1826_v31, %v1140_v39  ;;  %v1144_v21 = vsub.f32 1.0, %v1143_v18  ;;  %v1166_v0 = vand.u32 2147483647, %v1075_v19  ;;  %vm1162_vm0 = vweird.f32 %v1075_v19 }
 0x588   :  { %1176 = vst.msk [vmem:[%s2168_s12 + $0x18] sm:$0xff] %vm1172_vm14, %v1141_v63  ;;  %v1145_v62 = vmul.f32 %v1381_v12, %v1144_v21  ;;  %vm1167_vm4 = vcmp.eq.f32.partialorder %v1166_v0, 8.507059e+37 }
 0x58a   :  { %v1146_v22 = vadd.f32 %v1381_v12, %v1145_v62 }
 0x58b   :  { %v1383_v26 = vpop.eup %1382 }
 0x58c   :  { %v1150_v32 = vsel %vm1149_vm13, %v1381_v12, %v1146_v22  ;;  %v1158_v58 = vmul.f32 %v1383_v26, %v1075_v19  ;;  %v610_v31 = vpop.permute.xlu1 %609  ;;  %v1012_v33 = vpop.permute.xlu0 %1011  ;;  %vm1163_vm15 = vweird.f32 %v1383_v26 }
 0x58d   :  { %v1155_v37 = vsel %vm1152_vm3, %v1154_v20, %v1150_v32  ;;  %v1019_v44 = vmul.f32 %v1012_v33, %v932_v27  ;;  %vm1164_vm2 = vmor %vm1162_vm0, %vm1163_vm15  ;;  %v613_v24 = vmul.f32 %v610_v31, %v1936_v43 }
 0x58e   :  { %v1156_v41 = vmul.f32 %v1821_v36, %v1155_v37  ;;  %v1159_v46 = vsub.f32 1.0, %v1158_v58  ;;  %v1169_v36 = vor.u32 1.1754944e-38, %v1168_v14 }
 0x58f   :  { %v1021_v51 = vadd.f32 %v1019_v44, %v612_v47 }
 0x590   :  { %1177 = vst.msk [vmem:[%s2168_s12 + $0x20] sm:$0xff] %vm1172_vm14, %v1156_v41  ;;  %v1160_v5 = vmul.f32 %v1383_v26, %v1159_v46 }
 0x591   :  { %v1179_v52 = vmul.f32 0.5, %v1021_v51 }
 0x592   :  { %v1161_v34 = vadd.f32 %v1383_v26, %v1160_v5 }
 0x593   :  { %v1183_v17 = vadd.f32 %v1181_v8, %v1179_v52 }
 0x594   :  { %v1165_v4 = vsel %vm1164_vm2, %v1383_v26, %v1161_v34  ;;  %v1017_v54 = vpop.permute.xlu1 %1016 }
 0x595   :  { %v1170_v49 = vsel %vm1167_vm4, %v1169_v36, %v1165_v4  ;;  %v1020_v57 = vmul.f32 %v1017_v54, %v1934_v30  ;;  %1186 = vst.msk [vmem:[#allocation5] sm:$0xff] %vm1185_vm1, %v1183_v17 }
 0x596   :  { %v1171_v11 = vmul.f32 %v1819_v25, %v1170_v49 }
 0x597   :  { %v1022_v50 = vadd.f32 %v1020_v57, %v613_v24 }
 0x598   :  { %1178 = vst.msk [vmem:[%s2168_s12 + $0x28] sm:$0xff] %vm1172_vm14, %v1171_v11 }
 0x599   :  { %v1180_v30 = vmul.f32 0.5, %v1022_v50 }
 0x59b   :  { %v1184_v43 = vadd.f32 %v1182_v38, %v1180_v30 }
 0x59d   :  { %1187 = vst.msk [vmem:[#allocation5 + $0x8] sm:$0xff] %vm1185_vm1, %v1184_v43 }
 0x59e   :  { %1200 = dma.vmem_to_hbm [thread:$0]  %s1193_s15, 256, %s1195_s18, [#allocation4], %s1437_s26, %s1437_s26, %s1438_s27  }
 0x59f   :  { %1434 = dma.done.wait [#allocation4], 256  }
 0x5a0   :  { %1435 = vsyncadd [#allocation4], 4294967040 }
 0x5a1   :  { %1209 = vsyncpa [#allocation3], 1 }
 0x5a2   :  { %1210 = vsyncpa [#allocation4], 1 }

</bundles_post_ra>
